<compile_context>
chip_gen: v6e
topology: v6e:2x2x1
jax: 0.10.0
libtpu: 0.0.40
codegen_flags: <defaults>
</compile_context>

<pallas_src>
import jax
import jax.numpy as jnp
from jax import lax
from jax.experimental import pallas as pl
from jax.experimental.pallas import tpu as pltpu

KS = 7
PAD = KS // 2


def _round_up(n, m):
    return ((n + m - 1) // m) * m


def _pick_bt(B, C, H, W, itemsize, target_bytes=1 << 20):
    """Batch block size: divides B, keeps >=2 grid steps when B >= 2 (both v7x
    TensorCores busy), and stops growing once the per-step input block ~1 MiB."""
    bt = 1
    for cand in range(1, B + 1):
        if B % cand != 0:
            continue
        if B >= 2 and (B // cand) < 2:
            break
        bt = cand
        if cand * C * H * W * itemsize >= target_bytes:
            break
    return bt


def _build_band(weight, C, W):
    """Banded conv-weight matrices: band[c, dy, x + dx, x] = w'[c, dy, dx],
    with the mean-channel weights pre-scaled by 1/C.  Padded to lane-aligned
    (Kd, Nd) so the in-kernel matmuls are (H, Kd) @ (Kd, Nd)."""
    Wpad = W + 2 * PAD
    Kd = _round_up(Wpad, 128)
    Nd = _round_up(W, 128)
    w = weight[0].astype(jnp.float32)          # (2, KS, KS); ch0 = max, ch1 = avg
    w = w.at[1].multiply(1.0 / C)              # fold the 1/C of the channel mean
    j = jnp.arange(Kd)[:, None]                # padded-input column index
    x = jnp.arange(Nd)[None, :]                # output column index
    dx = j - x
    valid = (dx >= 0) & (dx < KS) & (x < W)
    band = w[:, :, jnp.clip(dx, 0, KS - 1)] * valid.astype(jnp.float32)[None, None]
    return band                                # (2, KS, Kd, Nd) f32


def _spatial_attention_kernel(band_ref, b_ref, x_ref, o_ref, mx_pad, sm_pad):
    # band_ref: VMEM f32[2, KS, Kd, Nd]  banded conv weights (avg ch pre-scaled by 1/C)
    # b_ref:    SMEM f32[1]              conv bias
    # x_ref:    VMEM [bt, C, H, W]       batch block
    # o_ref:    VMEM [bt, 1, H, W]
    # mx_pad / sm_pad: VMEM f32[bt, H + 2*PAD, Kd]  zero-padded pooled maps
    bt, C, H, W = x_ref.shape
    Kd = mx_pad.shape[-1]
    Nd = band_ref.shape[-1]

    # Single pass over the channel axis: running max + running sum (1/C is folded
    # into the band weights, so no separate mean / per-pixel multiply is needed).
    x0 = x_ref[:, 0].astype(jnp.float32)
    mx = x0
    sm = x0
    for c in range(1, C):
        xc = x_ref[:, c].astype(jnp.float32)
        mx = jnp.maximum(mx, xc)
        sm = sm + xc

    # Zero only the pad border; the interior is fully overwritten below.  Done every
    # step because scratch is per-TensorCore (megacore-safe; no stale garbage).
    ztop = jnp.zeros((bt, PAD, Kd), jnp.float32)
    zleft = jnp.zeros((bt, H + 2 * PAD, PAD), jnp.float32)
    zright = jnp.zeros((bt, H + 2 * PAD, Kd - PAD - W), jnp.float32)
    for padbuf in (mx_pad, sm_pad):
        padbuf[:, :PAD, :] = ztop
        padbuf[:, PAD + H:, :] = ztop
        padbuf[:, :, :PAD] = zleft
        padbuf[:, :, PAD + W:] = zright
    mx_pad[:, PAD:PAD + H, PAD:PAD + W] = mx
    sm_pad[:, PAD:PAD + H, PAD:PAD + W] = sm

    # 7x7 conv as 2*KS small MXU matmuls per batch element: dy shifts are cheap
    # sublane-offset row slices, dx shifts live inside the banded weight matrix,
    # and the contraction runs on lane-dense (H, Kd)@(Kd, Nd) tiles.
    for bi in range(bt):
        acc = jnp.zeros((H, Nd), jnp.float32)
        for c, src in enumerate((mx_pad, sm_pad)):
            for dy in range(KS):
                rows = src[bi, dy:dy + H, :]                      # (H, Kd)
                acc = acc + jnp.dot(rows, band_ref[c, dy],
                                    preferred_element_type=jnp.float32)
        out = jax.nn.sigmoid(acc[:, :W] + b_ref[0])
        o_ref[bi, 0] = out.astype(o_ref.dtype)


def spatial_attention(x, weight, bias):
    """x: (B, C, H, W); weight: (1, 2, KS, KS) OIHW; bias: (1,). Returns (B, 1, H, W)."""
    B, C, H, W = x.shape
    itemsize = jnp.dtype(x.dtype).itemsize
    bt = _pick_bt(B, C, H, W, itemsize)
    band = _build_band(weight, C, W)           # (2, KS, Kd, Nd) f32
    _, _, Kd, Nd = band.shape
    b_vec = bias.astype(jnp.float32)
    hpad = H + 2 * PAD

    # Raise the scoped-VMEM limit only when the (double-buffered) blocks would not
    # fit the default (16 MiB on v5e, 32 MiB on v6e/v7x).
    est = (2 * bt * C * H * W * itemsize       # input block, double-buffered
           + 2 * bt * H * W * itemsize         # output block, double-buffered
           + 2 * band.size * 4                 # resident banded weights
           + 2 * bt * hpad * Kd * 4)           # padded pooled-map scratch
    compiler_kwargs = dict(dimension_semantics=("parallel",))
    if est > 12 * 1024 * 1024:
        # NOTE: for very large C the better fix is a channel grid axis ("arbitrary")
        # with running max/sum accumulators, which also keeps v7x's 64 MiB VMEM happy.
        compiler_kwargs["vmem_limit_bytes"] = min(2 * est, 64 * 1024 * 1024)

    return pl.pallas_call(
        _spatial_attention_kernel,
        out_shape=jax.ShapeDtypeStruct((B, 1, H, W), x.dtype),
        grid_spec=pltpu.PrefetchScalarGridSpec(
            num_scalar_prefetch=0,
            grid=(B // bt,),
            in_specs=[
                pl.BlockSpec((2, KS, Kd, Nd), lambda i: (0, 0, 0, 0)),  # band (VMEM-resident)
                pl.BlockSpec(memory_space=pltpu.MemorySpace.SMEM),      # bias
                pl.BlockSpec((bt, C, H, W), lambda i: (i, 0, 0, 0)),    # batch block
            ],
            out_specs=pl.BlockSpec((bt, 1, H, W), lambda i: (i, 0, 0, 0)),
            scratch_shapes=[
                pltpu.VMEM((bt, hpad, Kd), jnp.float32),   # padded channel-max map
                pltpu.VMEM((bt, hpad, Kd), jnp.float32),   # padded channel-sum map
            ],
        ),
        compiler_params=pltpu.CompilerParams(**compiler_kwargs),
    )(band, b_vec, x)


def reference(x, weight, bias):
    max_r = jnp.max(x, axis=1, keepdims=True)
    avg_r = jnp.mean(x, axis=1, keepdims=True)
    res = jnp.concatenate([max_r, avg_r], axis=1)
    out = lax.conv_general_dilated(
        res, weight, window_strides=(1, 1),
        padding=((PAD, PAD), (PAD, PAD)),
        dimension_numbers=("NCHW", "OIHW", "NCHW"),
        precision=lax.Precision.HIGHEST)
    return jax.nn.sigmoid(out + bias.reshape(1, 1, 1, 1))


if __name__ == "__main__":
    key = jax.random.PRNGKey(0)
    kx, kw, kb = jax.random.split(key, 3)

    B, C, H, W = 2, 4, 16, 16
    x = jax.random.normal(kx, (B, C, H, W), dtype=jnp.float32)
    # Shapes from nn.Conv2d(2, 1, kernel_size=7, padding=3).
    weight = jax.random.normal(kw, (1, 2, KS, KS), dtype=jnp.float32) * 0.1
    bias = jax.random.normal(kb, (1,), dtype=jnp.float32) * 0.1

    out = jax.block_until_ready(spatial_attention(x, weight, bias))
    ref = jax.block_until_ready(reference(x, weight, bias))

    assert out.shape == (B, 1, H, W), out.shape
    # Tolerance sized for MXU matmul precision; structural/indexing bugs would show
    # up as O(1e-1) errors on the sigmoid output.
    err = float(jnp.max(jnp.abs(out - ref)))
    assert jnp.allclose(out, ref, atol=5e-3, rtol=5e-3), err
    print("KERNEL_OK")
</pallas_src>

<mosaic_0001>
module attributes {stable_mosaic.version = 11 : i64} {
  func.func @_spatial_attention_kernel(%arg0: i32, %arg1: memref<2x7x128x128xf32, #tpu.memory_space<vmem>>, %arg2: memref<1xf32, #tpu.memory_space<smem>>, %arg3: memref<1x4x16x16xf32, #tpu.memory_space<vmem>>, %arg4: memref<1x1x16x16xf32, #tpu.memory_space<vmem>>, %arg5: memref<1x22x128xf32, #tpu.memory_space<vmem>>, %arg6: memref<1x22x128xf32, #tpu.memory_space<vmem>>) attributes {dimension_semantics = [#tpu.dimension_semantics<parallel>], iteration_bounds = array<i64: 2>, scalar_prefetch = 0 : i64, scratch_operands = 2 : i64, tpu.core_type = #tpu.core_type<tc>, window_params = [{pipeline_mode = #tpu.pipeline_mode<synchronous>, transform_indices = @transform_0, window_bounds = array<i64: 2, 7, 128, 128>}, {transform_indices = @transform_1, window_bounds = array<i64: 1>}, {transform_indices = @transform_2, window_bounds = array<i64: 1, 4, 16, 16>}, {transform_indices = @transform_3, window_bounds = array<i64: 1, 1, 16, 16>}]} {
    %c0 = arith.constant 0 : index
    %c0_0 = arith.constant 0 : index
    %c0_1 = arith.constant 0 : index
    %c0_2 = arith.constant 0 : index
    %0 = vector.load %arg3[%c0, %c0_0, %c0_1, %c0_2] : memref<1x4x16x16xf32, #tpu.memory_space<vmem>>, vector<1x1x16x16xf32>
    %1 = vector.shape_cast %0 : vector<1x1x16x16xf32> to vector<1x16x16xf32>
    %c0_3 = arith.constant 0 : index
    %c1 = arith.constant 1 : index
    %c0_4 = arith.constant 0 : index
    %c0_5 = arith.constant 0 : index
    %2 = vector.load %arg3[%c0_3, %c1, %c0_4, %c0_5] : memref<1x4x16x16xf32, #tpu.memory_space<vmem>>, vector<1x1x16x16xf32>
    %3 = vector.shape_cast %2 : vector<1x1x16x16xf32> to vector<1x16x16xf32>
    %4 = arith.maximumf %1, %3 : vector<1x16x16xf32>
    %5 = arith.addf %1, %3 : vector<1x16x16xf32>
    %c0_6 = arith.constant 0 : index
    %c2 = arith.constant 2 : index
    %c0_7 = arith.constant 0 : index
    %c0_8 = arith.constant 0 : index
    %6 = vector.load %arg3[%c0_6, %c2, %c0_7, %c0_8] : memref<1x4x16x16xf32, #tpu.memory_space<vmem>>, vector<1x1x16x16xf32>
    %7 = vector.shape_cast %6 : vector<1x1x16x16xf32> to vector<1x16x16xf32>
    %8 = arith.maximumf %4, %7 : vector<1x16x16xf32>
    %9 = arith.addf %5, %7 : vector<1x16x16xf32>
    %c0_9 = arith.constant 0 : index
    %c3 = arith.constant 3 : index
    %c0_10 = arith.constant 0 : index
    %c0_11 = arith.constant 0 : index
    %10 = vector.load %arg3[%c0_9, %c3, %c0_10, %c0_11] : memref<1x4x16x16xf32, #tpu.memory_space<vmem>>, vector<1x1x16x16xf32>
    %11 = vector.shape_cast %10 : vector<1x1x16x16xf32> to vector<1x16x16xf32>
    %12 = arith.maximumf %8, %11 : vector<1x16x16xf32>
    %13 = arith.addf %9, %11 : vector<1x16x16xf32>
    %cst = arith.constant 0.000000e+00 : f32
    %14 = vector.broadcast %cst : f32 to vector<1x3x128xf32>
    %cst_12 = arith.constant 0.000000e+00 : f32
    %15 = vector.broadcast %cst_12 : f32 to vector<1x22x3xf32>
    %cst_13 = arith.constant 0.000000e+00 : f32
    %16 = vector.broadcast %cst_13 : f32 to vector<1x22x109xf32>
    %c0_14 = arith.constant 0 : index
    %c0_15 = arith.constant 0 : index
    %c0_16 = arith.constant 0 : index
    %17 = vector.load %arg5[%c0_14, %c0_15, %c0_16] : memref<1x22x128xf32, #tpu.memory_space<vmem>>, vector<1x3x128xf32>
    tpu.vector_store %arg5[%c0_14, %c0_15, %c0_16], %14 {strides = array<i32>} : memref<1x22x128xf32, #tpu.memory_space<vmem>>, vector<1x3x128xf32>,
    %c0_17 = arith.constant 0 : index
    %c19 = arith.constant 19 : index
    %c0_18 = arith.constant 0 : index
    %18 = vector.load %arg5[%c0_17, %c19, %c0_18] : memref<1x22x128xf32, #tpu.memory_space<vmem>>, vector<1x3x128xf32>
    tpu.vector_store %arg5[%c0_17, %c19, %c0_18], %14 {strides = array<i32>} : memref<1x22x128xf32, #tpu.memory_space<vmem>>, vector<1x3x128xf32>,
    %c0_19 = arith.constant 0 : index
    %c0_20 = arith.constant 0 : index
    %c0_21 = arith.constant 0 : index
    %19 = vector.load %arg5[%c0_19, %c0_20, %c0_21] : memref<1x22x128xf32, #tpu.memory_space<vmem>>, vector<1x22x3xf32>
    tpu.vector_store %arg5[%c0_19, %c0_20, %c0_21], %15 {strides = array<i32>} : memref<1x22x128xf32, #tpu.memory_space<vmem>>, vector<1x22x3xf32>,
    %c0_22 = arith.constant 0 : index
    %c0_23 = arith.constant 0 : index
    %c19_24 = arith.constant 19 : index
    %20 = vector.load %arg5[%c0_22, %c0_23, %c19_24] : memref<1x22x128xf32, #tpu.memory_space<vmem>>, vector<1x22x109xf32>
    tpu.vector_store %arg5[%c0_22, %c0_23, %c19_24], %16 {strides = array<i32>} : memref<1x22x128xf32, #tpu.memory_space<vmem>>, vector<1x22x109xf32>,
    %c0_25 = arith.constant 0 : index
    %c0_26 = arith.constant 0 : index
    %c0_27 = arith.constant 0 : index
    %21 = vector.load %arg6[%c0_25, %c0_26, %c0_27] : memref<1x22x128xf32, #tpu.memory_space<vmem>>, vector<1x3x128xf32>
    tpu.vector_store %arg6[%c0_25, %c0_26, %c0_27], %14 {strides = array<i32>} : memref<1x22x128xf32, #tpu.memory_space<vmem>>, vector<1x3x128xf32>,
    %c0_28 = arith.constant 0 : index
    %c19_29 = arith.constant 19 : index
    %c0_30 = arith.constant 0 : index
    %22 = vector.load %arg6[%c0_28, %c19_29, %c0_30] : memref<1x22x128xf32, #tpu.memory_space<vmem>>, vector<1x3x128xf32>
    tpu.vector_store %arg6[%c0_28, %c19_29, %c0_30], %14 {strides = array<i32>} : memref<1x22x128xf32, #tpu.memory_space<vmem>>, vector<1x3x128xf32>,
    %c0_31 = arith.constant 0 : index
    %c0_32 = arith.constant 0 : index
    %c0_33 = arith.constant 0 : index
    %23 = vector.load %arg6[%c0_31, %c0_32, %c0_33] : memref<1x22x128xf32, #tpu.memory_space<vmem>>, vector<1x22x3xf32>
    tpu.vector_store %arg6[%c0_31, %c0_32, %c0_33], %15 {strides = array<i32>} : memref<1x22x128xf32, #tpu.memory_space<vmem>>, vector<1x22x3xf32>,
    %c0_34 = arith.constant 0 : index
    %c0_35 = arith.constant 0 : index
    %c19_36 = arith.constant 19 : index
    %24 = vector.load %arg6[%c0_34, %c0_35, %c19_36] : memref<1x22x128xf32, #tpu.memory_space<vmem>>, vector<1x22x109xf32>
    tpu.vector_store %arg6[%c0_34, %c0_35, %c19_36], %16 {strides = array<i32>} : memref<1x22x128xf32, #tpu.memory_space<vmem>>, vector<1x22x109xf32>,
    %c0_37 = arith.constant 0 : index
    %c3_38 = arith.constant 3 : index
    %c3_39 = arith.constant 3 : index
    %25 = vector.load %arg5[%c0_37, %c3_38, %c3_39] : memref<1x22x128xf32, #tpu.memory_space<vmem>>, vector<1x16x16xf32>
    tpu.vector_store %arg5[%c0_37, %c3_38, %c3_39], %12 {strides = array<i32>} : memref<1x22x128xf32, #tpu.memory_space<vmem>>, vector<1x16x16xf32>,
    %c0_40 = arith.constant 0 : index
    %c3_41 = arith.constant 3 : index
    %c3_42 = arith.constant 3 : index
    %26 = vector.load %arg6[%c0_40, %c3_41, %c3_42] : memref<1x22x128xf32, #tpu.memory_space<vmem>>, vector<1x16x16xf32>
    tpu.vector_store %arg6[%c0_40, %c3_41, %c3_42], %13 {strides = array<i32>} : memref<1x22x128xf32, #tpu.memory_space<vmem>>, vector<1x16x16xf32>,
    %cst_43 = arith.constant 0.000000e+00 : f32
    %27 = vector.broadcast %cst_43 : f32 to vector<16x128xf32>
    %c0_44 = arith.constant 0 : index
    %c0_45 = arith.constant 0 : index
    %c0_46 = arith.constant 0 : index
    %28 = vector.load %arg5[%c0_44, %c0_45, %c0_46] : memref<1x22x128xf32, #tpu.memory_space<vmem>>, vector<1x16x128xf32>
    %29 = vector.shape_cast %28 : vector<1x16x128xf32> to vector<16x128xf32>
    %c0_47 = arith.constant 0 : index
    %c0_48 = arith.constant 0 : index
    %c0_49 = arith.constant 0 : index
    %c0_50 = arith.constant 0 : index
    %30 = vector.load %arg1[%c0_47, %c0_48, %c0_49, %c0_50] : memref<2x7x128x128xf32, #tpu.memory_space<vmem>>, vector<1x1x128x128xf32>
    %31 = vector.shape_cast %30 : vector<1x1x128x128xf32> to vector<128x128xf32>
    %cst_51 = arith.constant dense<0.000000e+00> : vector<16x128xf32>
    %32 = tpu.matmul %29, %31, %cst_51 {dimension_numbers = #tpu.dot_dimension_numbers<[1], [0], [0], [1], [0, 0, 1, 1], [], []>} : vector<16x128xf32>, vector<128x128xf32>, vector<16x128xf32> -> vector<16x128xf32>
    %33 = arith.addf %27, %32 : vector<16x128xf32>
    %c0_52 = arith.constant 0 : index
    %c1_53 = arith.constant 1 : index
    %c0_54 = arith.constant 0 : index
    %34 = vector.load %arg5[%c0_52, %c1_53, %c0_54] : memref<1x22x128xf32, #tpu.memory_space<vmem>>, vector<1x16x128xf32>
    %35 = vector.shape_cast %34 : vector<1x16x128xf32> to vector<16x128xf32>
    %c0_55 = arith.constant 0 : index
    %c1_56 = arith.constant 1 : index
    %c0_57 = arith.constant 0 : index
    %c0_58 = arith.constant 0 : index
    %36 = vector.load %arg1[%c0_55, %c1_56, %c0_57, %c0_58] : memref<2x7x128x128xf32, #tpu.memory_space<vmem>>, vector<1x1x128x128xf32>
    %37 = vector.shape_cast %36 : vector<1x1x128x128xf32> to vector<128x128xf32>
    %cst_59 = arith.constant dense<0.000000e+00> : vector<16x128xf32>
    %38 = tpu.matmul %35, %37, %cst_59 {dimension_numbers = #tpu.dot_dimension_numbers<[1], [0], [0], [1], [0, 0, 1, 1], [], []>} : vector<16x128xf32>, vector<128x128xf32>, vector<16x128xf32> -> vector<16x128xf32>
    %39 = arith.addf %33, %38 : vector<16x128xf32>
    %c0_60 = arith.constant 0 : index
    %c2_61 = arith.constant 2 : index
    %c0_62 = arith.constant 0 : index
    %40 = vector.load %arg5[%c0_60, %c2_61, %c0_62] : memref<1x22x128xf32, #tpu.memory_space<vmem>>, vector<1x16x128xf32>
    %41 = vector.shape_cast %40 : vector<1x16x128xf32> to vector<16x128xf32>
    %c0_63 = arith.constant 0 : index
    %c2_64 = arith.constant 2 : index
    %c0_65 = arith.constant 0 : index
    %c0_66 = arith.constant 0 : index
    %42 = vector.load %arg1[%c0_63, %c2_64, %c0_65, %c0_66] : memref<2x7x128x128xf32, #tpu.memory_space<vmem>>, vector<1x1x128x128xf32>
    %43 = vector.shape_cast %42 : vector<1x1x128x128xf32> to vector<128x128xf32>
    %cst_67 = arith.constant dense<0.000000e+00> : vector<16x128xf32>
    %44 = tpu.matmul %41, %43, %cst_67 {dimension_numbers = #tpu.dot_dimension_numbers<[1], [0], [0], [1], [0, 0, 1, 1], [], []>} : vector<16x128xf32>, vector<128x128xf32>, vector<16x128xf32> -> vector<16x128xf32>
    %45 = arith.addf %39, %44 : vector<16x128xf32>
    %c0_68 = arith.constant 0 : index
    %c3_69 = arith.constant 3 : index
    %c0_70 = arith.constant 0 : index
    %46 = vector.load %arg5[%c0_68, %c3_69, %c0_70] : memref<1x22x128xf32, #tpu.memory_space<vmem>>, vector<1x16x128xf32>
    %47 = vector.shape_cast %46 : vector<1x16x128xf32> to vector<16x128xf32>
    %c0_71 = arith.constant 0 : index
    %c3_72 = arith.constant 3 : index
    %c0_73 = arith.constant 0 : index
    %c0_74 = arith.constant 0 : index
    %48 = vector.load %arg1[%c0_71, %c3_72, %c0_73, %c0_74] : memref<2x7x128x128xf32, #tpu.memory_space<vmem>>, vector<1x1x128x128xf32>
    %49 = vector.shape_cast %48 : vector<1x1x128x128xf32> to vector<128x128xf32>
    %cst_75 = arith.constant dense<0.000000e+00> : vector<16x128xf32>
    %50 = tpu.matmul %47, %49, %cst_75 {dimension_numbers = #tpu.dot_dimension_numbers<[1], [0], [0], [1], [0, 0, 1, 1], [], []>} : vector<16x128xf32>, vector<128x128xf32>, vector<16x128xf32> -> vector<16x128xf32>
    %51 = arith.addf %45, %50 : vector<16x128xf32>
    %c0_76 = arith.constant 0 : index
    %c4 = arith.constant 4 : index
    %c0_77 = arith.constant 0 : index
    %52 = vector.load %arg5[%c0_76, %c4, %c0_77] : memref<1x22x128xf32, #tpu.memory_space<vmem>>, vector<1x16x128xf32>
    %53 = vector.shape_cast %52 : vector<1x16x128xf32> to vector<16x128xf32>
    %c0_78 = arith.constant 0 : index
    %c4_79 = arith.constant 4 : index
    %c0_80 = arith.constant 0 : index
    %c0_81 = arith.constant 0 : index
    %54 = vector.load %arg1[%c0_78, %c4_79, %c0_80, %c0_81] : memref<2x7x128x128xf32, #tpu.memory_space<vmem>>, vector<1x1x128x128xf32>
    %55 = vector.shape_cast %54 : vector<1x1x128x128xf32> to vector<128x128xf32>
    %cst_82 = arith.constant dense<0.000000e+00> : vector<16x128xf32>
    %56 = tpu.matmul %53, %55, %cst_82 {dimension_numbers = #tpu.dot_dimension_numbers<[1], [0], [0], [1], [0, 0, 1, 1], [], []>} : vector<16x128xf32>, vector<128x128xf32>, vector<16x128xf32> -> vector<16x128xf32>
    %57 = arith.addf %51, %56 : vector<16x128xf32>
    %c0_83 = arith.constant 0 : index
    %c5 = arith.constant 5 : index
    %c0_84 = arith.constant 0 : index
    %58 = vector.load %arg5[%c0_83, %c5, %c0_84] : memref<1x22x128xf32, #tpu.memory_space<vmem>>, vector<1x16x128xf32>
    %59 = vector.shape_cast %58 : vector<1x16x128xf32> to vector<16x128xf32>
    %c0_85 = arith.constant 0 : index
    %c5_86 = arith.constant 5 : index
    %c0_87 = arith.constant 0 : index
    %c0_88 = arith.constant 0 : index
    %60 = vector.load %arg1[%c0_85, %c5_86, %c0_87, %c0_88] : memref<2x7x128x128xf32, #tpu.memory_space<vmem>>, vector<1x1x128x128xf32>
    %61 = vector.shape_cast %60 : vector<1x1x128x128xf32> to vector<128x128xf32>
    %cst_89 = arith.constant dense<0.000000e+00> : vector<16x128xf32>
    %62 = tpu.matmul %59, %61, %cst_89 {dimension_numbers = #tpu.dot_dimension_numbers<[1], [0], [0], [1], [0, 0, 1, 1], [], []>} : vector<16x128xf32>, vector<128x128xf32>, vector<16x128xf32> -> vector<16x128xf32>
    %63 = arith.addf %57, %62 : vector<16x128xf32>
    %c0_90 = arith.constant 0 : index
    %c6 = arith.constant 6 : index
    %c0_91 = arith.constant 0 : index
    %64 = vector.load %arg5[%c0_90, %c6, %c0_91] : memref<1x22x128xf32, #tpu.memory_space<vmem>>, vector<1x16x128xf32>
    %65 = vector.shape_cast %64 : vector<1x16x128xf32> to vector<16x128xf32>
    %c0_92 = arith.constant 0 : index
    %c6_93 = arith.constant 6 : index
    %c0_94 = arith.constant 0 : index
    %c0_95 = arith.constant 0 : index
    %66 = vector.load %arg1[%c0_92, %c6_93, %c0_94, %c0_95] : memref<2x7x128x128xf32, #tpu.memory_space<vmem>>, vector<1x1x128x128xf32>
    %67 = vector.shape_cast %66 : vector<1x1x128x128xf32> to vector<128x128xf32>
    %cst_96 = arith.constant dense<0.000000e+00> : vector<16x128xf32>
    %68 = tpu.matmul %65, %67, %cst_96 {dimension_numbers = #tpu.dot_dimension_numbers<[1], [0], [0], [1], [0, 0, 1, 1], [], []>} : vector<16x128xf32>, vector<128x128xf32>, vector<16x128xf32> -> vector<16x128xf32>
    %69 = arith.addf %63, %68 : vector<16x128xf32>
    %c0_97 = arith.constant 0 : index
    %c0_98 = arith.constant 0 : index
    %c0_99 = arith.constant 0 : index
    %70 = vector.load %arg6[%c0_97, %c0_98, %c0_99] : memref<1x22x128xf32, #tpu.memory_space<vmem>>, vector<1x16x128xf32>
    %71 = vector.shape_cast %70 : vector<1x16x128xf32> to vector<16x128xf32>
    %c1_100 = arith.constant 1 : index
    %c0_101 = arith.constant 0 : index
    %c0_102 = arith.constant 0 : index
    %c0_103 = arith.constant 0 : index
    %72 = vector.load %arg1[%c1_100, %c0_101, %c0_102, %c0_103] : memref<2x7x128x128xf32, #tpu.memory_space<vmem>>, vector<1x1x128x128xf32>
    %73 = vector.shape_cast %72 : vector<1x1x128x128xf32> to vector<128x128xf32>
    %cst_104 = arith.constant dense<0.000000e+00> : vector<16x128xf32>
    %74 = tpu.matmul %71, %73, %cst_104 {dimension_numbers = #tpu.dot_dimension_numbers<[1], [0], [0], [1], [0, 0, 1, 1], [], []>} : vector<16x128xf32>, vector<128x128xf32>, vector<16x128xf32> -> vector<16x128xf32>
    %75 = arith.addf %69, %74 : vector<16x128xf32>
    %c0_105 = arith.constant 0 : index
    %c1_106 = arith.constant 1 : index
    %c0_107 = arith.constant 0 : index
    %76 = vector.load %arg6[%c0_105, %c1_106, %c0_107] : memref<1x22x128xf32, #tpu.memory_space<vmem>>, vector<1x16x128xf32>
    %77 = vector.shape_cast %76 : vector<1x16x128xf32> to vector<16x128xf32>
    %c1_108 = arith.constant 1 : index
    %c1_109 = arith.constant 1 : index
    %c0_110 = arith.constant 0 : index
    %c0_111 = arith.constant 0 : index
    %78 = vector.load %arg1[%c1_108, %c1_109, %c0_110, %c0_111] : memref<2x7x128x128xf32, #tpu.memory_space<vmem>>, vector<1x1x128x128xf32>
    %79 = vector.shape_cast %78 : vector<1x1x128x128xf32> to vector<128x128xf32>
    %cst_112 = arith.constant dense<0.000000e+00> : vector<16x128xf32>
    %80 = tpu.matmul %77, %79, %cst_112 {dimension_numbers = #tpu.dot_dimension_numbers<[1], [0], [0], [1], [0, 0, 1, 1], [], []>} : vector<16x128xf32>, vector<128x128xf32>, vector<16x128xf32> -> vector<16x128xf32>
    %81 = arith.addf %75, %80 : vector<16x128xf32>
    %c0_113 = arith.constant 0 : index
    %c2_114 = arith.constant 2 : index
    %c0_115 = arith.constant 0 : index
    %82 = vector.load %arg6[%c0_113, %c2_114, %c0_115] : memref<1x22x128xf32, #tpu.memory_space<vmem>>, vector<1x16x128xf32>
    %83 = vector.shape_cast %82 : vector<1x16x128xf32> to vector<16x128xf32>
    %c1_116 = arith.constant 1 : index
    %c2_117 = arith.constant 2 : index
    %c0_118 = arith.constant 0 : index
    %c0_119 = arith.constant 0 : index
    %84 = vector.load %arg1[%c1_116, %c2_117, %c0_118, %c0_119] : memref<2x7x128x128xf32, #tpu.memory_space<vmem>>, vector<1x1x128x128xf32>
    %85 = vector.shape_cast %84 : vector<1x1x128x128xf32> to vector<128x128xf32>
    %cst_120 = arith.constant dense<0.000000e+00> : vector<16x128xf32>
    %86 = tpu.matmul %83, %85, %cst_120 {dimension_numbers = #tpu.dot_dimension_numbers<[1], [0], [0], [1], [0, 0, 1, 1], [], []>} : vector<16x128xf32>, vector<128x128xf32>, vector<16x128xf32> -> vector<16x128xf32>
    %87 = arith.addf %81, %86 : vector<16x128xf32>
    %c0_121 = arith.constant 0 : index
    %c3_122 = arith.constant 3 : index
    %c0_123 = arith.constant 0 : index
    %88 = vector.load %arg6[%c0_121, %c3_122, %c0_123] : memref<1x22x128xf32, #tpu.memory_space<vmem>>, vector<1x16x128xf32>
    %89 = vector.shape_cast %88 : vector<1x16x128xf32> to vector<16x128xf32>
    %c1_124 = arith.constant 1 : index
    %c3_125 = arith.constant 3 : index
    %c0_126 = arith.constant 0 : index
    %c0_127 = arith.constant 0 : index
    %90 = vector.load %arg1[%c1_124, %c3_125, %c0_126, %c0_127] : memref<2x7x128x128xf32, #tpu.memory_space<vmem>>, vector<1x1x128x128xf32>
    %91 = vector.shape_cast %90 : vector<1x1x128x128xf32> to vector<128x128xf32>
    %cst_128 = arith.constant dense<0.000000e+00> : vector<16x128xf32>
    %92 = tpu.matmul %89, %91, %cst_128 {dimension_numbers = #tpu.dot_dimension_numbers<[1], [0], [0], [1], [0, 0, 1, 1], [], []>} : vector<16x128xf32>, vector<128x128xf32>, vector<16x128xf32> -> vector<16x128xf32>
    %93 = arith.addf %87, %92 : vector<16x128xf32>
    %c0_129 = arith.constant 0 : index
    %c4_130 = arith.constant 4 : index
    %c0_131 = arith.constant 0 : index
    %94 = vector.load %arg6[%c0_129, %c4_130, %c0_131] : memref<1x22x128xf32, #tpu.memory_space<vmem>>, vector<1x16x128xf32>
    %95 = vector.shape_cast %94 : vector<1x16x128xf32> to vector<16x128xf32>
    %c1_132 = arith.constant 1 : index
    %c4_133 = arith.constant 4 : index
    %c0_134 = arith.constant 0 : index
    %c0_135 = arith.constant 0 : index
    %96 = vector.load %arg1[%c1_132, %c4_133, %c0_134, %c0_135] : memref<2x7x128x128xf32, #tpu.memory_space<vmem>>, vector<1x1x128x128xf32>
    %97 = vector.shape_cast %96 : vector<1x1x128x128xf32> to vector<128x128xf32>
    %cst_136 = arith.constant dense<0.000000e+00> : vector<16x128xf32>
    %98 = tpu.matmul %95, %97, %cst_136 {dimension_numbers = #tpu.dot_dimension_numbers<[1], [0], [0], [1], [0, 0, 1, 1], [], []>} : vector<16x128xf32>, vector<128x128xf32>, vector<16x128xf32> -> vector<16x128xf32>
    %99 = arith.addf %93, %98 : vector<16x128xf32>
    %c0_137 = arith.constant 0 : index
    %c5_138 = arith.constant 5 : index
    %c0_139 = arith.constant 0 : index
    %100 = vector.load %arg6[%c0_137, %c5_138, %c0_139] : memref<1x22x128xf32, #tpu.memory_space<vmem>>, vector<1x16x128xf32>
    %101 = vector.shape_cast %100 : vector<1x16x128xf32> to vector<16x128xf32>
    %c1_140 = arith.constant 1 : index
    %c5_141 = arith.constant 5 : index
    %c0_142 = arith.constant 0 : index
    %c0_143 = arith.constant 0 : index
    %102 = vector.load %arg1[%c1_140, %c5_141, %c0_142, %c0_143] : memref<2x7x128x128xf32, #tpu.memory_space<vmem>>, vector<1x1x128x128xf32>
    %103 = vector.shape_cast %102 : vector<1x1x128x128xf32> to vector<128x128xf32>
    %cst_144 = arith.constant dense<0.000000e+00> : vector<16x128xf32>
    %104 = tpu.matmul %101, %103, %cst_144 {dimension_numbers = #tpu.dot_dimension_numbers<[1], [0], [0], [1], [0, 0, 1, 1], [], []>} : vector<16x128xf32>, vector<128x128xf32>, vector<16x128xf32> -> vector<16x128xf32>
    %105 = arith.addf %99, %104 : vector<16x128xf32>
    %c0_145 = arith.constant 0 : index
    %c6_146 = arith.constant 6 : index
    %c0_147 = arith.constant 0 : index
    %106 = vector.load %arg6[%c0_145, %c6_146, %c0_147] : memref<1x22x128xf32, #tpu.memory_space<vmem>>, vector<1x16x128xf32>
    %107 = vector.shape_cast %106 : vector<1x16x128xf32> to vector<16x128xf32>
    %c1_148 = arith.constant 1 : index
    %c6_149 = arith.constant 6 : index
    %c0_150 = arith.constant 0 : index
    %c0_151 = arith.constant 0 : index
    %108 = vector.load %arg1[%c1_148, %c6_149, %c0_150, %c0_151] : memref<2x7x128x128xf32, #tpu.memory_space<vmem>>, vector<1x1x128x128xf32>
    %109 = vector.shape_cast %108 : vector<1x1x128x128xf32> to vector<128x128xf32>
    %cst_152 = arith.constant dense<0.000000e+00> : vector<16x128xf32>
    %110 = tpu.matmul %107, %109, %cst_152 {dimension_numbers = #tpu.dot_dimension_numbers<[1], [0], [0], [1], [0, 0, 1, 1], [], []>} : vector<16x128xf32>, vector<128x128xf32>, vector<16x128xf32> -> vector<16x128xf32>
    %111 = arith.addf %105, %110 : vector<16x128xf32>
    %112 = vector.extract_strided_slice %111 {offsets = [0, 0], sizes = [16, 16], strides = [1, 1]} : vector<16x128xf32> to vector<16x16xf32>
    %c0_153 = arith.constant 0 : index
    %113 = memref.load %arg2[%c0_153] : memref<1xf32, #tpu.memory_space<smem>>
    %114 = vector.broadcast %113 : f32 to vector<16x16xf32>
    %115 = arith.addf %112, %114 : vector<16x16xf32>
    %116 = arith.negf %115 : vector<16x16xf32>
    %117 = math.exp %116 : vector<16x16xf32>
    %cst_154 = arith.constant 1.000000e+00 : f32
    %118 = vector.broadcast %cst_154 : f32 to vector<16x16xf32>
    %119 = arith.addf %118, %117 : vector<16x16xf32>
    %120 = arith.divf %118, %119 : vector<16x16xf32>
    %c0_155 = arith.constant 0 : index
    %c0_156 = arith.constant 0 : index
    %c0_157 = arith.constant 0 : index
    %c0_158 = arith.constant 0 : index
    %121 = vector.load %arg4[%c0_155, %c0_156, %c0_157, %c0_158] : memref<1x1x16x16xf32, #tpu.memory_space<vmem>>, vector<1x1x16x16xf32>
    %122 = vector.shape_cast %121 : vector<1x1x16x16xf32> to vector<16x16xf32>
    %123 = vector.shape_cast %120 : vector<16x16xf32> to vector<1x1x16x16xf32>
    tpu.vector_store %arg4[%c0_155, %c0_156, %c0_157, %c0_158], %123 {strides = array<i32>} : memref<1x1x16x16xf32, #tpu.memory_space<vmem>>, vector<1x1x16x16xf32>,
    return
  }
  func.func @transform_0(%arg0: i32) -> (i32, i32, i32, i32) {
    %c0_i32 = arith.constant 0 : i32
    %c0_i32_0 = arith.constant 0 : i32
    %c0_i32_1 = arith.constant 0 : i32
    %c0_i32_2 = arith.constant 0 : i32
    %c0_i32_3 = arith.constant 0 : i32
    return %c0_i32, %c0_i32_0, %c0_i32_1, %c0_i32_2 : i32, i32, i32, i32
  }
  func.func @transform_1(%arg0: i32) -> i32 {
    %c0_i32 = arith.constant 0 : i32
    %c0_i32_0 = arith.constant 0 : i32
    return %c0_i32 : i32
  }
  func.func @transform_2(%arg0: i32) -> (i32, i32, i32, i32) {
    %c0_i32 = arith.constant 0 : i32
    %c0_i32_0 = arith.constant 0 : i32
    %c0_i32_1 = arith.constant 0 : i32
    %c0_i32_2 = arith.constant 0 : i32
    return %arg0, %c0_i32, %c0_i32_0, %c0_i32_1 : i32, i32, i32, i32
  }
  func.func @transform_3(%arg0: i32) -> (i32, i32, i32, i32) {
    %c0_i32 = arith.constant 0 : i32
    %c0_i32_0 = arith.constant 0 : i32
    %c0_i32_1 = arith.constant 0 : i32
    %c0_i32_2 = arith.constant 0 : i32
    return %arg0, %c0_i32, %c0_i32_0, %c0_i32_1 : i32, i32, i32, i32
  }
}

</mosaic_0001>

<bundles_post_ra>
// kernel: tpu_custom_call.1
= control target key start
LH: loop header
LB: loop body
LE: loop exit
PB: predicated region body
PF: predicated region fallthrough
CT: control target
= control target key end

     0   :  { %s2919_s0 = inlined_call_operand.hbm [shape: f32[2,7,128,128], index: 0, kind: input, shape index: {}]   ;;  %s2920_s1 = inlined_call_operand.<no memory space> [shape: f32[1], index: 1, kind: input, shape index: {}]   ;;  %s2921_s2 = inlined_call_operand.hbm [shape: f32[2,4,16,16], index: 2, kind: input, shape index: {}]   ;;  %s2922_s3 = inlined_call_operand.hbm [shape: f32[2,1,16,16], index: 3, kind: output, shape index: {}]  }
   0x1   :  { %8 = sst [smem:[#allocation4]] %s2920_s1 }
   0x2   :  { %9 = vsyncpa [#allocation6], 0 }
   0x3   :  { %10 = vsyncpa [#allocation9], 0 }
   0x4   :  { %12 = vsyncpa [#allocation9 + $0x1], 0 }
   0x5   :  { %13 = vsyncpa [#allocation7], 0 }
   0x6   :  { %15 = vsyncpa [#allocation7 + $0x1], 0  ;;  %s2721_s14 = smov 0   ;;  %s2723_s15 = smov 0  }
   0x7   :  { %s2725_s16 = smov 0   ;;  %s2727_s17 = smov 0  }
   0x8 LB: > { %s2742_s1 = sadd.s32 4294967295, %s2687_s17   ;;  %s1726_s18 = sadd.s32 4294967294, %s2687_s17   ;;  %s2687_s17 = sphi %s2727_s17, %s2944_s17   ;;  %s2683_s16 = sphi %s2725_s16, %s2943_s16   ;;  %s2679_s15 = sphi %s2723_s15, %s2942_s15   ;;  %s2675_s14 = sphi %s2721_s14, %s2941_s14  }
   0x9   : > { %p83_p0 = scmp.ne.s32.totalorder %s2679_s15, %s2675_s14  ;;  %p2923_p1 = scmp.eq.s32.totalorder %s2742_s1, 0 }
   0xa   : > { %p113_p3 = scmp.eq.s32.totalorder %s1726_s18, 1  ;;  %p1727_p5 = scmp.ge.s32.totalorder %s2687_s17, 1 }
   0xb   : > { %p2751_p4 = por %p2923_p1, %p83_p0  ;;  %p120_p7 = scmp.lt.s32.totalorder %s2687_s17, 3 }
   0xc   : > { %p2756_p6 = por %p113_p3, %p83_p0  ;;  %s2689_s22 = smov [#allocation5]  }
   0xd   : > { %s2927_s19 = scalar_select %p2751_p4, 1, 0 }
   0xe   : > { %s2928_s20 = scalar_select %p2756_p6, 1, 0 }
   0xf   : > { %p2761_p8 = pnand %p1727_p5, %p120_p7  ;;  %s132_s23 = sshll.u32 %s2689_s22, 4  ;;  %s133_s23 = int_to_ptr.vmem [resolvable:$true] %s132_s23 }
  0x10   : > { %s2775_s25 = sadd.s32 1, %s2687_s17   ;;  %s70_s26 = sadd.s32 1, %s2683_s16 }
  0x11   : > { %s2929_s21 = scalar_select %p2761_p8, 1, 0 }
  0x12   : > { %p2502_p9 = pneg %p2761_p8  ;;  %s67_s27 = ssub.s32 %s2687_s17, %s2775_s25 }
  0x13   : > { %s2576_s28 = scalar_lea.vmem %s133_s23, 28672  ;;  %p2584_p5 = scmp.lt.s32.totalorder %s133_s23, %s133_s23 }
  0x14   : > { %p2770_p11 = pnand %p2502_p9, %p2923_p1  ;;  %p2577_p13 = scmp.ne.s32.totalorder %s133_s23, %s2576_s28 }
  0x15   : > { %p2585_p7 = scmp.lt.s32.totalorder %s2576_s28, %s2576_s28 }
  0x16   : > { %p2567_p12 = pneg %p2770_p11 }
  0x17   : > { %p2586_p10 = por %p2585_p7, %p2584_p5 }
  0x18   : > { %p2579_p0 = pnand %p2577_p13, %p2567_p12 }
  0x1a   : > { %p2580_p3 = pneg %p2579_p0 }
  0x1c   : > { %p2587_p2 = pnand %p2586_p10, %p2580_p3 }
  0x1e   : > { %2590 = shalt.err (!%p2587_p2)
}
  0x1f   : > { %s2690_s29 = smov 128   ;;  %s2691_s30 = smov 8  }
  0x20   : > { %2505 = dma.hbm_to_vmem [thread:$0]  (!%p2770_p11), %s2919_s0, 28672, %s133_s23, [#allocation6], %s2690_s29, %s2690_s29, %s2691_s30  }
  0x21   : > { %p68_p2 = scmp.eq.s32.totalorder %s67_s27, 0  ;;  %p77_p9 = scmp.ne.s32.totalorder %s2683_s16, %s2679_s15 }
  0x22   : > { %p78_p10 = scmp.eq.s32.totalorder %s2687_s17, 0  ;;  %p2515_p12 = scmp.lt.s32.totalorder %s2687_s17, 2 }
  0x23   : > { %s2795_s6 = scalar_select %p68_p2, %s2683_s16, %s70_s26  }
  0x24   : > { %p79_p13 = por %p78_p10, %p77_p9  ;;  %p2931_p0 = scmp.eq.s32.totalorder %s2742_s1, 1 }
  0x25   : > { %s149_s8 = sand.u32 1, %s2683_s16   ;;  %s1750_s9 = sshll.u32 %s2687_s17, 10 }
  0x26   : > { %p2799_p3 = por %p2931_p0, %p77_p9  ;;  %s1730_s10 = sshll.u32 %s149_s8, 6 }
  0x27   : > { %s2808_s13 = scalar_lea.hbm %s2921_s2, %s1750_s9  ;;  %s153_s18 = scalar_lea.vmem [#allocation8], %s1730_s10 }
  0x28   : > { %s2932_s7 = scalar_select %p2799_p3, 1, 0 }
  0x29   : > { %s160_s22 = sshll.u32 %s153_s18, 4  ;;  %p2810_p11 = pnand %p2515_p12, %p79_p13  ;;  %s2814_s22 = int_to_ptr.vmem [resolvable:$true] %s160_s22 }
  0x2a   : > { %s2816_s24 = scalar_lea.sflag [#allocation9], %s149_s8  ;;  %s2591_s26 = scalar_lea.hbm %s2808_s13, 1024 }
  0x2b   : > { %p2592_p5 = scmp.ne.s32.totalorder %s2808_s13, %s2591_s26  ;;  %p2593_p7 = pneg %p2810_p11 }
  0x2c   : > { %s2596_s4 = scalar_lea.hbm %s2921_s2, 2048  ;;  %p2597_p10 = scmp.lt.s32.totalorder %s2808_s13, %s2921_s2 }
  0x2d   : > { %p2594_p2 = pnand %p2593_p7, %p2592_p5  ;;  %p2598_p12 = scmp.lt.s32.totalorder %s2596_s4, %s2591_s26 }
  0x2f   : > { %p2595_p9 = pneg %p2594_p2  ;;  %p2599_p13 = por %p2598_p12, %p2597_p10 }
  0x31   : > { %p2600_p0 = pnand %p2599_p13, %p2595_p9 }
  0x33   : > { %2603 = shalt.err (!%p2600_p0)
}
  0x34   : > { %s2604_s8 = scalar_lea.vmem %s2814_s22, 1024  ;;  %s2692_s10 = smov [#allocation8]  }
  0x35   : > { %p2605_p1 = scmp.ne.s32.totalorder %s2814_s22, %s2604_s8  ;;  %s2609_s11 = sshll.u32 %s2692_s10, 4  ;;  %s2610_s11 = int_to_ptr.vmem [resolvable:$false] %s2609_s11 }
  0x36   : > { %s2611_s12 = scalar_lea.vmem %s2610_s11, 2048  ;;  %p2612_p2 = scmp.lt.s32.totalorder %s2814_s22, %s2610_s11 }
  0x37   : > { %p2607_p6 = pnand %p2605_p1, %p2593_p7  ;;  %p2613_p3 = scmp.lt.s32.totalorder %s2611_s12, %s2604_s8 }
  0x39   : > { %p2608_p5 = pneg %p2607_p6  ;;  %p2614_p4 = por %p2613_p3, %p2612_p2 }
  0x3b   : > { %p2615_p8 = pnand %p2614_p4, %p2608_p5 }
  0x3d   : > { %2618 = shalt.err (!%p2615_p8)
}
  0x3e   : > { %2509 = dma.hbm_to_vmem [thread:$0]  (!%p2810_p11), %s2808_s13, 1024, %s2814_s22, %s2816_s24, %s2690_s29, %s2690_s29, %s2691_s30  }
  0x3f   : > { %p2934_p1 = scmp.ne.s32.totalorder %s2929_s21, 0 }
  0x40   : > { %p2935_p6 = scmp.eq.s32.totalorder (!%p2934_p1), %s2742_s1, 0 }
  0x41   : > { %172 = sbr.rel (%p2934_p1) target bundleno = 661 (0x295), region = 32 }
  0x46   : > { %2662 = dma.done.wait (%p2935_p6), [#allocation6], 28672   ;;  %p2936_p7 = pmov %p2935_p6 }
  0x47   : > { %s2847_s18 = sand.u32 1, %s2679_s15   ;;  %p2937_p4 = scmp.ne.s32.totalorder %s2927_s19, 0 }
  0x48   : > { %2664 = vsyncadd (%p2936_p7), [#allocation6], 4294938624  ;;  %s1735_s23 = sshll.u32 %s2847_s18, 6  ;;  %s179_s26 = scalar_lea.sflag [#allocation9], %s2847_s18 }
  0x49   : > { %s2851_s27 = scalar_lea.vmem [#allocation8], %s1735_s23 }
  0x4a   : > { %2666 = dma.done.wait (%p2937_p4), %s179_s26, 1024  }
  0x4b   : > { %2668 = vsyncadd (%p2937_p4), %s179_s26, 4294966272  ;;  %vm230_vm0 = vcmask 23552   ;;  %vm235_vm1 = vcmask 1047704   ;;  %v2693_v0 = vmov 0.0   ;;  %vm233_vm2 = vcmask 21504   ;;  %v205_v1 = vld [vmem:[%s2851_s27] sm:$0xff] }
  0x4c   : > { %228 = vst [vmem:[#allocation2] sm:$0x7] %v2693_v0  ;;  %232 = vst.msk [vmem:[#allocation2 + $0x8] sm:$0xff] %vm230_vm0, %v2693_v0  ;;  %vm238_vm3 = vcmask 1045656   ;;  %v1737_v2 = vld [vmem:[%s2851_s27 + $0x10] sm:$0xff]  ;;  %v1739_v3 = vld [vmem:[%s2851_s27 + $0x20] sm:$0xff] }
  0x4d   : > { %229 = vst [vmem:[#allocation2 + $0x13] sm:$0x7] %v2693_v0  ;;  %240 = vst [vmem:[#allocation3] sm:$0x7] %v2693_v0  ;;  %v210_v4 = vmax.f32 %v205_v1, %v1737_v2  ;;  %v206_v5 = vld [vmem:[%s2851_s27 + $0x8] sm:$0xff]  ;;  %v1738_v6 = vld [vmem:[%s2851_s27 + $0x18] sm:$0xff]  ;;  %v212_v7 = vadd.f32 %v1737_v2, %v205_v1 }
  0x4e   : > { %241 = vst [vmem:[#allocation3 + $0x13] sm:$0x7] %v2693_v0  ;;  %243 = vst.msk [vmem:[#allocation3 + $0x8] sm:$0xff] %vm230_vm0, %v2693_v0  ;;  %v1741_v8 = vld [vmem:[%s2851_s27 + $0x30] sm:$0xff]  ;;  %v211_v9 = vmax.f32 %v206_v5, %v1738_v6  ;;  %v1740_v10 = vld [vmem:[%s2851_s27 + $0x28] sm:$0xff]  ;;  %v213_v12 = vadd.f32 %v1738_v6, %v206_v5  ;;  %s2694_s19 = smov 3  }
  0x4f   : > { %231 = vst.msk [vmem:[#allocation2] sm:$0xff] %vm230_vm0, %v2693_v0  ;;  %242 = vst.msk [vmem:[#allocation3] sm:$0xff] %vm230_vm0, %v2693_v0  ;;  %v305_v11 = vld [vmem:[#allocation5 + $0xf8] sm:$0xff]  ;;  %v217_v13 = vmax.f32 %v210_v4, %v1739_v3  ;;  %v219_v15 = vadd.f32 %v1739_v3, %v212_v7  ;;  %v304_v16 = vld [vmem:[#allocation5 + $0xf0] sm:$0xff]  ;;  %vm256_vm4 = vcmask 154648   ;;  %s1608_s21 = sld [smem:[#allocation4]] }
  0x50   : > { %237 = vst.msk [vmem:[#allocation2 + $0x8] sm:$0xff] %vm235_vm1, %v2693_v0  ;;  %246 = vst.msk [vmem:[#allocation3 + $0x8] sm:$0xff] %vm235_vm1, %v2693_v0  ;;  %2004 = vmatprep.subr.mxu0 %v305_v11  ;;  %v286_v14 = vld [vmem:[#allocation5 + $0x78] sm:$0xff]  ;;  %v285_v17 = vld [vmem:[#allocation5 + $0x70] sm:$0xff]  ;;  %v218_v18 = vmax.f32 %v211_v9, %v1740_v10  ;;  %v220_v20 = vadd.f32 %v1740_v10, %v213_v12  ;;  %s1736_s29 = sshll.u32 %s2847_s18, 4  ;;  %s1751_s30 = sshll.u32 %s2742_s1, 8 }
  0x51   : > { %234 = vst.msk [vmem:[#allocation2 + $0x10] sm:$0x3f] %vm233_vm2, %v2693_v0  ;;  %244 = vst.msk [vmem:[#allocation3 + $0x10] sm:$0x3f] %vm233_vm2, %v2693_v0  ;;  %v1742_v19 = vld [vmem:[%s2851_s27 + $0x38] sm:$0xff]  ;;  %2039 = vmatprep.subr.mxu1 %v286_v14  ;;  %2005 = vmatpush3.msra.mxu0 %v305_v11  ;;  %v224_v21 = vmax.f32 %v217_v13, %v1741_v8  ;;  %v226_v22 = vadd.f32 %v1741_v8, %v219_v15  ;;  %v303_v23 = vld [vmem:[#allocation5 + $0xe8] sm:$0xff]  ;;  %s2874_s4 = scalar_lea.hbm %s2922_s3, %s1751_s30 }
  0x52   : > { %236 = vst.msk [vmem:[#allocation2] sm:$0xff] %vm235_vm1, %v2693_v0  ;;  %245 = vst.msk [vmem:[#allocation3] sm:$0xff] %vm235_vm1, %v2693_v0  ;;  %2040 = vmatpush3.msra.mxu1 %v286_v14  ;;  %2006 = vmatprep.subr.mxu0 %v304_v16  ;;  %v284_v24 = vld [vmem:[#allocation5 + $0x68] sm:$0xff]  ;;  %v225_v25 = vmax.f32 %v218_v18, %v1742_v19  ;;  %v227_v26 = vadd.f32 %v1742_v19, %v220_v20  ;;  %v302_v27 = vld [vmem:[#allocation5 + $0xe0] sm:$0xff]  ;;  %s204_s13 = scalar_lea.vmem [#allocation10], %s1736_s29  ;;  %vm1624_vm5 = vcmask 130048  }
  0x53   : > { %239 = vst.msk [vmem:[#allocation2 + $0x10] sm:$0x3f] %vm238_vm3, %v2693_v0  ;;  %247 = vst.msk [vmem:[#allocation3 + $0x10] sm:$0x3f] %vm238_vm3, %v2693_v0  ;;  %2041 = vmatprep.subr.mxu1 %v285_v17  ;;  %2007 = vmatpush3.msra.mxu0 %v304_v16  ;;  %v283_v28 = vld [vmem:[#allocation5 + $0x60] sm:$0xff]  ;;  %v301_v29 = vld [vmem:[#allocation5 + $0xd8] sm:$0xff] }
  0x54   : > { %250 = vrot.lane.b32.xlu0 %v224_v21, %s2694_s19  ;;  %261 = vrot.lane.b32.xlu1 %v226_v22, %s2694_s19  ;;  %v282_v30 = vld [vmem:[#allocation5 + $0x58] sm:$0xff]  ;;  %v300_v31 = vld [vmem:[#allocation5 + $0xd0] sm:$0xff]  ;;  %v299_v33 = vld [vmem:[#allocation5 + $0xc8] sm:$0xff]  ;;  %s1641_s22 = sshll.u32 %s204_s13, 4  ;;  %s1628_s5 = scalar_lea.sflag [#allocation7], %s2847_s18  ;;  %s2876_s22 = int_to_ptr.vmem [resolvable:$true] %s1641_s22 }
  0x55   : > { %2042 = vmatpush3.msra.mxu1 %v285_v17  ;;  %2008 = vmatprep.subr.mxu0 %v303_v23  ;;  %v281_v32 = vld [vmem:[#allocation5 + $0x50] sm:$0xff]  ;;  %v280_v34 = vld [vmem:[#allocation5 + $0x48] sm:$0xff]  ;;  %v298_v35 = vld [vmem:[#allocation5 + $0xc0] sm:$0xff]  ;;  %s2619_s9 = scalar_lea.vmem %s2876_s22, 256  ;;  %p2938_p3 = scmp.ne.s32.totalorder %s2932_s7, 0 }
  0x56   : > { %2043 = vmatprep.subr.mxu1 %v284_v24  ;;  %2009 = vmatpush3.msra.mxu0 %v303_v23  ;;  %v279_v36 = vld [vmem:[#allocation5 + $0x40] sm:$0xff]  ;;  %v297_v37 = vld [vmem:[#allocation5 + $0xb8] sm:$0xff]  ;;  %v296_v39 = vld [vmem:[#allocation5 + $0xb0] sm:$0xff]  ;;  %p2620_p8 = scmp.ne.s32.totalorder %s2876_s22, %s2619_s9  ;;  %s2695_s1 = smov [#allocation10]  }
  0x57   : > { %2044 = vmatpush3.msra.mxu1 %v284_v24  ;;  %2010 = vmatprep.subr.mxu0 %v302_v27  ;;  %v278_v38 = vld [vmem:[#allocation5 + $0x38] sm:$0xff]  ;;  %v277_v40 = vld [vmem:[#allocation5 + $0x30] sm:$0xff]  ;;  %v295_v41 = vld [vmem:[#allocation5 + $0xa8] sm:$0xff]  ;;  %s2623_s8 = sshll.u32 %s2695_s1, 4  ;;  %s2624_s8 = int_to_ptr.vmem [resolvable:$false] %s2623_s8 }
  0x58   : > { %252 = vrot.lane.b32.xlu0 %v225_v25, %s2694_s19  ;;  %263 = vrot.lane.b32.xlu1 %v227_v26, %s2694_s19  ;;  %v276_v42 = vld [vmem:[#allocation5 + $0x28] sm:$0xff]  ;;  %v294_v43 = vld [vmem:[#allocation5 + $0xa0] sm:$0xff]  ;;  %v293_v45 = vld [vmem:[#allocation5 + $0x98] sm:$0xff]  ;;  %p2621_p11 = pnand %p2620_p8, %p2938_p3  ;;  %s2625_s10 = scalar_lea.vmem %s2624_s8, 512 }
  0x59   : > { %2045 = vmatprep.subr.mxu1 %v283_v28  ;;  %2011 = vmatpush3.msra.mxu0 %v302_v27  ;;  %v275_v44 = vld [vmem:[#allocation5 + $0x20] sm:$0xff]  ;;  %v274_v46 = vld [vmem:[#allocation5 + $0x18] sm:$0xff]  ;;  %v292_v47 = vld [vmem:[#allocation5 + $0x90] sm:$0xff]  ;;  %p2626_p10 = scmp.lt.s32.totalorder %s2876_s22, %s2624_s8  ;;  %p2627_p12 = scmp.lt.s32.totalorder %s2625_s10, %s2619_s9 }
  0x5a   : > { %2046 = vmatpush3.msra.mxu1 %v283_v28  ;;  %2012 = vmatprep.subr.mxu0 %v301_v29  ;;  %v273_v48 = vld [vmem:[#allocation5 + $0x10] sm:$0xff]  ;;  %v291_v49 = vld [vmem:[#allocation5 + $0x88] sm:$0xff]  ;;  %v290_v51 = vld [vmem:[#allocation5 + $0x80] sm:$0xff]  ;;  %p2622_p9 = pneg %p2621_p11 }
  0x5b   : > { %2047 = vmatprep.subr.mxu1 %v282_v30  ;;  %2013 = vmatpush3.msra.mxu0 %v301_v29  ;;  %v272_v50 = vld [vmem:[#allocation5 + $0x8] sm:$0xff]  ;;  %v271_v52 = vld [vmem:[#allocation5] sm:$0xff]  ;;  %v474_v53 = vld [vmem:[#allocation5 + $0x178] sm:$0xff]  ;;  %p2628_p13 = por %p2627_p12, %p2626_p10 }
  0x5c   : > { %2048 = vmatpush3.msra.mxu1 %v282_v30  ;;  %2014 = vmatprep.subr.mxu0 %v300_v31  ;;  %v570_v54 = vld [vmem:[#allocation5 + $0x1f8] sm:$0xff]  ;;  %v473_v63 = vld [vmem:[#allocation5 + $0x170] sm:$0xff]  ;;  %v472_v3 = vld [vmem:[#allocation5 + $0x168] sm:$0xff] }
  0x5d   : > { %2049 = vmatprep.subr.mxu1 %v281_v32  ;;  %2015 = vmatpush3.msra.mxu0 %v300_v31  ;;  %v569_v0 = vld [vmem:[#allocation5 + $0x1f0] sm:$0xff]  ;;  %v568_v4 = vld [vmem:[#allocation5 + $0x1e8] sm:$0xff]  ;;  %v471_v5 = vld [vmem:[#allocation5 + $0x160] sm:$0xff]  ;;  %p2629_p0 = pnand %p2628_p13, %p2622_p9 }
  0x5e   : > { %2050 = vmatpush3.msra.mxu1 %v281_v32  ;;  %2016 = vmatprep.subr.mxu0 %v299_v33  ;;  %v567_v6 = vld [vmem:[#allocation5 + $0x1e0] sm:$0xff]  ;;  %v470_v7 = vld [vmem:[#allocation5 + $0x158] sm:$0xff]  ;;  %v469_v9 = vld [vmem:[#allocation5 + $0x150] sm:$0xff] }
  0x5f   : > { %2051 = vmatprep.subr.mxu1 %v280_v34  ;;  %2017 = vmatpush3.msra.mxu0 %v299_v33  ;;  %v566_v8 = vld [vmem:[#allocation5 + $0x1d8] sm:$0xff]  ;;  %v565_v10 = vld [vmem:[#allocation5 + $0x1d0] sm:$0xff]  ;;  %v468_v11 = vld [vmem:[#allocation5 + $0x148] sm:$0xff] }
  0x60   : > { %2052 = vmatpush3.msra.mxu1 %v280_v34  ;;  %2018 = vmatprep.subr.mxu0 %v298_v35  ;;  %v564_v12 = vld [vmem:[#allocation5 + $0x1c8] sm:$0xff]  ;;  %v467_v13 = vld [vmem:[#allocation5 + $0x140] sm:$0xff]  ;;  %v466_v15 = vld [vmem:[#allocation5 + $0x138] sm:$0xff] }
  0x61   : > { %2053 = vmatprep.subr.mxu1 %v279_v36  ;;  %2019 = vmatpush3.msra.mxu0 %v298_v35  ;;  %v563_v14 = vld [vmem:[#allocation5 + $0x1c0] sm:$0xff]  ;;  %v562_v16 = vld [vmem:[#allocation5 + $0x1b8] sm:$0xff]  ;;  %v465_v17 = vld [vmem:[#allocation5 + $0x130] sm:$0xff] }
  0x62   : > { %2054 = vmatpush3.msra.mxu1 %v279_v36  ;;  %2020 = vmatprep.subr.mxu0 %v297_v37  ;;  %v561_v18 = vld [vmem:[#allocation5 + $0x1b0] sm:$0xff]  ;;  %v464_v19 = vld [vmem:[#allocation5 + $0x128] sm:$0xff]  ;;  %v463_v21 = vld [vmem:[#allocation5 + $0x120] sm:$0xff] }
  0x63   : > { %2055 = vmatprep.subr.mxu1 %v278_v38  ;;  %2021 = vmatpush3.msra.mxu0 %v297_v37  ;;  %v560_v20 = vld [vmem:[#allocation5 + $0x1a8] sm:$0xff]  ;;  %v559_v22 = vld [vmem:[#allocation5 + $0x1a0] sm:$0xff]  ;;  %v462_v23 = vld [vmem:[#allocation5 + $0x118] sm:$0xff] }
  0x64   : > { %2056 = vmatpush3.msra.mxu1 %v278_v38  ;;  %2022 = vmatprep.subr.mxu0 %v296_v39  ;;  %v558_v24 = vld [vmem:[#allocation5 + $0x198] sm:$0xff]  ;;  %v461_v25 = vld [vmem:[#allocation5 + $0x110] sm:$0xff]  ;;  %v460_v27 = vld [vmem:[#allocation5 + $0x108] sm:$0xff] }
  0x65   : > { %2057 = vmatprep.subr.mxu1 %v277_v40  ;;  %2023 = vmatpush3.msra.mxu0 %v296_v39  ;;  %v557_v26 = vld [vmem:[#allocation5 + $0x190] sm:$0xff]  ;;  %v556_v28 = vld [vmem:[#allocation5 + $0x188] sm:$0xff]  ;;  %v459_v29 = vld [vmem:[#allocation5 + $0x100] sm:$0xff] }
  0x66   : > { %2058 = vmatpush3.msra.mxu1 %v277_v40  ;;  %2024 = vmatprep.subr.mxu0 %v295_v41  ;;  %v555_v30 = vld [vmem:[#allocation5 + $0x180] sm:$0xff]  ;;  %v666_v31 = vld [vmem:[#allocation5 + $0x278] sm:$0xff]  ;;  %v665_v36 = vld [vmem:[#allocation5 + $0x270] sm:$0xff] }
  0x67   : > { %2059 = vmatprep.subr.mxu1 %v276_v42  ;;  %2025 = vmatpush3.msra.mxu0 %v295_v41  ;;  %v762_v32 = vld [vmem:[#allocation5 + $0x2f8] sm:$0xff]  ;;  %v761_v37 = vld [vmem:[#allocation5 + $0x2f0] sm:$0xff]  ;;  %v664_v39 = vld [vmem:[#allocation5 + $0x268] sm:$0xff] }
  0x68   : > { %2060 = vmatpush3.msra.mxu1 %v276_v42  ;;  %2026 = vmatprep.subr.mxu0 %v294_v43  ;;  %v760_v40 = vld [vmem:[#allocation5 + $0x2e8] sm:$0xff]  ;;  %v663_v41 = vld [vmem:[#allocation5 + $0x260] sm:$0xff] }
  0x69   : > { %2061 = vmatprep.subr.mxu1 %v275_v44  ;;  %2027 = vmatpush3.msra.mxu0 %v294_v43  ;;  %v759_v42 = vld [vmem:[#allocation5 + $0x2e0] sm:$0xff]  ;;  %v662_v43 = vld [vmem:[#allocation5 + $0x258] sm:$0xff] }
  0x6a   : > { %2062 = vmatpush3.msra.mxu1 %v275_v44  ;;  %2028 = vmatprep.subr.mxu0 %v293_v45  ;;  %v758_v44 = vld [vmem:[#allocation5 + $0x2d8] sm:$0xff] }
  0x6b   : > { %2063 = vmatprep.subr.mxu1 %v274_v46  ;;  %2029 = vmatpush3.msra.mxu0 %v293_v45  ;;  %v661_v45 = vld [vmem:[#allocation5 + $0x250] sm:$0xff] }
  0x6c   : > { %2064 = vmatpush3.msra.mxu1 %v274_v46  ;;  %2030 = vmatprep.subr.mxu0 %v292_v47  ;;  %v757_v46 = vld [vmem:[#allocation5 + $0x2d0] sm:$0xff] }
  0x6d   : > { %2065 = vmatprep.subr.mxu1 %v273_v48  ;;  %2031 = vmatpush3.msra.mxu0 %v292_v47  ;;  %v660_v47 = vld [vmem:[#allocation5 + $0x248] sm:$0xff] }
  0x6e   : > { %2066 = vmatpush3.msra.mxu1 %v273_v48  ;;  %2032 = vmatprep.subr.mxu0 %v291_v49  ;;  %v756_v48 = vld [vmem:[#allocation5 + $0x2c8] sm:$0xff] }
  0x6f   : > { %2067 = vmatprep.subr.mxu1 %v272_v50  ;;  %2033 = vmatpush3.msra.mxu0 %v291_v49  ;;  %v659_v49 = vld [vmem:[#allocation5 + $0x240] sm:$0xff] }
  0x70   : > { %2068 = vmatpush3.msra.mxu1 %v272_v50  ;;  %2034 = vmatprep.subr.mxu0 %v290_v51  ;;  %v755_v50 = vld [vmem:[#allocation5 + $0x2c0] sm:$0xff] }
  0x71   : > { %2069 = vmatprep.subr.mxu1 %v271_v52  ;;  %2035 = vmatpush3.msra.mxu0 %v290_v51  ;;  %v658_v51 = vld [vmem:[#allocation5 + $0x238] sm:$0xff] }
  0x72   : > { %2070 = vmatpush3.msra.mxu1 %v271_v52  ;;  %2074 = vmatprep.subr.mxu0 %v474_v53  ;;  %v754_v52 = vld [vmem:[#allocation5 + $0x2b8] sm:$0xff] }
  0x73   : > { %2109 = vmatprep.subr.mxu1 %v570_v54 }
  0xc6   : > { %v251_v55 = vpop.permute.xlu0 %250  ;;  %v262_v56 = vpop.permute.xlu1 %261 }
  0xc7   : > { %257 = vst.msk [vmem:[#allocation2 + $0x3] sm:$0xff] %vm256_vm4, %v251_v55  ;;  %267 = vst.msk [vmem:[#allocation3 + $0x3] sm:$0xff] %vm256_vm4, %v262_v56  ;;  %v656_v55 = vld [vmem:[#allocation5 + $0x228] sm:$0xff] }
  0xc8   : > { %v752_v56 = vld [vmem:[#allocation5 + $0x2a8] sm:$0xff] }
  0xca   : > { %v253_v57 = vpop.permute.xlu0 %252  ;;  %v264_v58 = vpop.permute.xlu1 %263 }
  0xcb   : > { %258 = vst.msk [vmem:[#allocation2 + $0xb] sm:$0xff] %vm256_vm4, %v253_v57  ;;  %268 = vst.msk [vmem:[#allocation3 + $0xb] sm:$0xff] %vm256_vm4, %v264_v58  ;;  %v655_v57 = vld [vmem:[#allocation5 + $0x220] sm:$0xff] }
  0xcc   : > { %v751_v58 = vld [vmem:[#allocation5 + $0x2a0] sm:$0xff] }
  0xce   : > { %v287_v59 = vld [vmem:[#allocation2 + $0x1] sm:$0xff] }
  0xcf   : > { %v269_v60 = vld [vmem:[#allocation2] sm:$0xff]  ;;  %2036 = vmatprep.mubr.f32.mxu0 %v287_v59  ;;  %v654_v59 = vld [vmem:[#allocation5 + $0x218] sm:$0xff] }
  0xd0   : > { %2071 = vmatprep.mubr.f32.mxu1 %v269_v60  ;;  %v456_v1 = vld [vmem:[#allocation2 + $0x2] sm:$0xff] }
  0xd1   : > { %v552_v2 = vld [vmem:[#allocation2 + $0x3] sm:$0xff] }
  0xd2   : > { %v288_v61 = vld [vmem:[#allocation2 + $0x9] sm:$0xff] }
  0xd3   : > { %v270_v62 = vld [vmem:[#allocation2 + $0x8] sm:$0xff]  ;;  %2037 = vmatmul.mubr.f32.vlgmr.msra.gmra.mxu0 %v288_v61  ;;  %v653_v61 = vld [vmem:[#allocation5 + $0x210] sm:$0xff] }
  0xd4   : > { %2072 = vmatmul.mubr.f32.vlgmr.msra.gmra.mxu1 %v270_v62  ;;  %2075 = vmatpush3.msra.mxu0 %v474_v53  ;;  %v457_v33 = vld [vmem:[#allocation2 + $0xa] sm:$0xff]  ;;  %v657_v53 = vld [vmem:[#allocation5 + $0x230] sm:$0xff] }
  0xd5   : > { %2110 = vmatpush3.msra.mxu1 %v570_v54  ;;  %2076 = vmatprep.subr.mxu0 %v473_v63  ;;  %v553_v34 = vld [vmem:[#allocation2 + $0xb] sm:$0xff]  ;;  %v753_v54 = vld [vmem:[#allocation5 + $0x2b0] sm:$0xff] }
  0xd6   : > { %2106 = vmatprep.mubr.f32.mxu0 %v456_v1  ;;  %2111 = vmatprep.subr.mxu1 %v569_v0  ;;  %v648_v35 = vld [vmem:[#allocation2 + $0x4] sm:$0xff]  ;;  %v651_v1 = vld [vmem:[#allocation5 + $0x200] sm:$0xff] }
  0xd7   : > { %2141 = vmatprep.mubr.f32.mxu1 %v552_v2  ;;  %2077 = vmatpush3.msra.mxu0 %v473_v63  ;;  %v744_v38 = vld [vmem:[#allocation2 + $0x5] sm:$0xff]  ;;  %v652_v63 = vld [vmem:[#allocation5 + $0x208] sm:$0xff]  ;;  %v747_v2 = vld [vmem:[#allocation5 + $0x280] sm:$0xff] }
  0xd8   : > { %2112 = vmatpush3.msra.mxu1 %v569_v0  ;;  %2078 = vmatprep.subr.mxu0 %v472_v3  ;;  %v750_v60 = vld [vmem:[#allocation5 + $0x298] sm:$0xff]  ;;  %v749_v62 = vld [vmem:[#allocation5 + $0x290] sm:$0xff]  ;;  %v748_v0 = vld [vmem:[#allocation5 + $0x288] sm:$0xff] }
  0xd9   : > { %2113 = vmatprep.subr.mxu1 %v568_v4  ;;  %2079 = vmatpush3.msra.mxu0 %v472_v3  ;;  %v858_v3 = vld [vmem:[#allocation5 + $0x378] sm:$0xff] }
  0xda   : > { %2114 = vmatpush3.msra.mxu1 %v568_v4  ;;  %2080 = vmatprep.subr.mxu0 %v471_v5  ;;  %v954_v4 = vld [vmem:[#allocation5 + $0x3f8] sm:$0xff] }
  0xdb   : > { %2115 = vmatprep.subr.mxu1 %v567_v6  ;;  %2081 = vmatpush3.msra.mxu0 %v471_v5  ;;  %v649_v5 = vld [vmem:[#allocation2 + $0xc] sm:$0xff] }
  0xdc   : > { %2116 = vmatpush3.msra.mxu1 %v567_v6  ;;  %2082 = vmatprep.subr.mxu0 %v470_v7  ;;  %v745_v6 = vld [vmem:[#allocation2 + $0xd] sm:$0xff] }
  0xdd   : > { %2117 = vmatprep.subr.mxu1 %v566_v8  ;;  %2083 = vmatpush3.msra.mxu0 %v470_v7  ;;  %v857_v7 = vld [vmem:[#allocation5 + $0x370] sm:$0xff] }
  0xde   : > { %2118 = vmatpush3.msra.mxu1 %v566_v8  ;;  %2084 = vmatprep.subr.mxu0 %v469_v9  ;;  %v840_v8 = vld [vmem:[#allocation2 + $0x6] sm:$0xff] }
  0xdf   : > { %2119 = vmatprep.subr.mxu1 %v565_v10  ;;  %2085 = vmatpush3.msra.mxu0 %v469_v9  ;;  %v953_v9 = vld [vmem:[#allocation5 + $0x3f0] sm:$0xff] }
  0xe0   : > { %2120 = vmatpush3.msra.mxu1 %v565_v10  ;;  %2086 = vmatprep.subr.mxu0 %v468_v11  ;;  %v856_v10 = vld [vmem:[#allocation5 + $0x368] sm:$0xff] }
  0xe1   : > { %2121 = vmatprep.subr.mxu1 %v564_v12  ;;  %2087 = vmatpush3.msra.mxu0 %v468_v11  ;;  %v952_v11 = vld [vmem:[#allocation5 + $0x3e8] sm:$0xff] }
  0xe2   : > { %2122 = vmatpush3.msra.mxu1 %v564_v12  ;;  %2088 = vmatprep.subr.mxu0 %v467_v13  ;;  %v855_v12 = vld [vmem:[#allocation5 + $0x360] sm:$0xff] }
  0xe3   : > { %2123 = vmatprep.subr.mxu1 %v563_v14  ;;  %2089 = vmatpush3.msra.mxu0 %v467_v13  ;;  %v951_v13 = vld [vmem:[#allocation5 + $0x3e0] sm:$0xff] }
  0xe4   : > { %2124 = vmatpush3.msra.mxu1 %v563_v14  ;;  %2090 = vmatprep.subr.mxu0 %v466_v15  ;;  %v854_v14 = vld [vmem:[#allocation5 + $0x358] sm:$0xff] }
  0xe5   : > { %2125 = vmatprep.subr.mxu1 %v562_v16  ;;  %2091 = vmatpush3.msra.mxu0 %v466_v15  ;;  %v950_v15 = vld [vmem:[#allocation5 + $0x3d8] sm:$0xff] }
  0xe6   : > { %2126 = vmatpush3.msra.mxu1 %v562_v16  ;;  %2092 = vmatprep.subr.mxu0 %v465_v17  ;;  %v853_v16 = vld [vmem:[#allocation5 + $0x350] sm:$0xff] }
  0xe7   : > { %2127 = vmatprep.subr.mxu1 %v561_v18  ;;  %2093 = vmatpush3.msra.mxu0 %v465_v17  ;;  %v949_v17 = vld [vmem:[#allocation5 + $0x3d0] sm:$0xff] }
  0xe8   : > { %2128 = vmatpush3.msra.mxu1 %v561_v18  ;;  %2094 = vmatprep.subr.mxu0 %v464_v19  ;;  %v852_v18 = vld [vmem:[#allocation5 + $0x348] sm:$0xff] }
  0xe9   : > { %2129 = vmatprep.subr.mxu1 %v560_v20  ;;  %2095 = vmatpush3.msra.mxu0 %v464_v19  ;;  %v948_v19 = vld [vmem:[#allocation5 + $0x3c8] sm:$0xff] }
  0xea   : > { %2130 = vmatpush3.msra.mxu1 %v560_v20  ;;  %2096 = vmatprep.subr.mxu0 %v463_v21  ;;  %v851_v20 = vld [vmem:[#allocation5 + $0x340] sm:$0xff] }
  0xeb   : > { %2131 = vmatprep.subr.mxu1 %v559_v22  ;;  %2097 = vmatpush3.msra.mxu0 %v463_v21  ;;  %v947_v21 = vld [vmem:[#allocation5 + $0x3c0] sm:$0xff] }
  0xec   : > { %2132 = vmatpush3.msra.mxu1 %v559_v22  ;;  %2098 = vmatprep.subr.mxu0 %v462_v23  ;;  %v850_v22 = vld [vmem:[#allocation5 + $0x338] sm:$0xff] }
  0xed   : > { %2133 = vmatprep.subr.mxu1 %v558_v24  ;;  %2099 = vmatpush3.msra.mxu0 %v462_v23  ;;  %v946_v23 = vld [vmem:[#allocation5 + $0x3b8] sm:$0xff] }
  0xee   : > { %2134 = vmatpush3.msra.mxu1 %v558_v24  ;;  %2100 = vmatprep.subr.mxu0 %v461_v25  ;;  %v849_v24 = vld [vmem:[#allocation5 + $0x330] sm:$0xff] }
  0xef   : > { %2135 = vmatprep.subr.mxu1 %v557_v26  ;;  %2101 = vmatpush3.msra.mxu0 %v461_v25  ;;  %v945_v25 = vld [vmem:[#allocation5 + $0x3b0] sm:$0xff] }
  0xf0   : > { %2136 = vmatpush3.msra.mxu1 %v557_v26  ;;  %2102 = vmatprep.subr.mxu0 %v460_v27  ;;  %v848_v26 = vld [vmem:[#allocation5 + $0x328] sm:$0xff] }
  0xf1   : > { %2137 = vmatprep.subr.mxu1 %v556_v28  ;;  %2103 = vmatpush3.msra.mxu0 %v460_v27  ;;  %v944_v27 = vld [vmem:[#allocation5 + $0x3a8] sm:$0xff] }
  0xf2   : > { %2138 = vmatpush3.msra.mxu1 %v556_v28  ;;  %2104 = vmatprep.subr.mxu0 %v459_v29  ;;  %v847_v28 = vld [vmem:[#allocation5 + $0x320] sm:$0xff] }
  0xf3   : > { %2139 = vmatprep.subr.mxu1 %v555_v30  ;;  %2105 = vmatpush3.msra.mxu0 %v459_v29  ;;  %v943_v29 = vld [vmem:[#allocation5 + $0x3a0] sm:$0xff] }
  0xf4   : > { %2140 = vmatpush3.msra.mxu1 %v555_v30  ;;  %2107 = vmatmul.mubr.f32.vlgmr.msra.gmra.mxu0 %v457_v33  ;;  %v846_v30 = vld [vmem:[#allocation5 + $0x318] sm:$0xff]  ;;  %v941_v33 = vld [vmem:[#allocation5 + $0x390] sm:$0xff] }
  0xf5   : > { %2142 = vmatmul.mubr.f32.vlgmr.msra.gmra.mxu1 %v553_v34  ;;  %2144 = vmatprep.subr.mxu0 %v666_v31  ;;  %v844_v34 = vld [vmem:[#allocation5 + $0x308] sm:$0xff] }
  0xf6   : > { %2179 = vmatprep.subr.mxu1 %v762_v32  ;;  %2145 = vmatpush3.msra.mxu0 %v666_v31  ;;  %v942_v31 = vld [vmem:[#allocation5 + $0x398] sm:$0xff] }
  0xf7   : > { %2176 = vmatprep.mubr.f32.mxu0 %v648_v35  ;;  %2180 = vmatpush3.msra.mxu1 %v762_v32  ;;  %v845_v32 = vld [vmem:[#allocation5 + $0x310] sm:$0xff]  ;;  %v940_v35 = vld [vmem:[#allocation5 + $0x388] sm:$0xff] }
  0xf8   : > { %2211 = vmatprep.mubr.f32.mxu1 %v744_v38  ;;  %2146 = vmatprep.subr.mxu0 %v665_v36  ;;  %v936_v38 = vld [vmem:[#allocation3] sm:$0xff] }
  0xf9   : > { %2181 = vmatprep.subr.mxu1 %v761_v37  ;;  %2147 = vmatpush3.msra.mxu0 %v665_v36  ;;  %v843_v36 = vld [vmem:[#allocation5 + $0x300] sm:$0xff] }
  0xfa   : > { %2182 = vmatpush3.msra.mxu1 %v761_v37  ;;  %2148 = vmatprep.subr.mxu0 %v664_v39  ;;  %v939_v37 = vld [vmem:[#allocation5 + $0x380] sm:$0xff] }
  0xfb   : > { %2183 = vmatprep.subr.mxu1 %v760_v40  ;;  %2149 = vmatpush3.msra.mxu0 %v664_v39  ;;  %v937_v39 = vld [vmem:[#allocation3 + $0x8] sm:$0xff] }
  0xfc   : > { %2184 = vmatpush3.msra.mxu1 %v760_v40  ;;  %2150 = vmatprep.subr.mxu0 %v663_v41  ;;  %v1050_v40 = vld [vmem:[#allocation5 + $0x478] sm:$0xff] }
  0xfd   : > { %2185 = vmatprep.subr.mxu1 %v759_v42  ;;  %2151 = vmatpush3.msra.mxu0 %v663_v41  ;;  %v1146_v41 = vld [vmem:[#allocation5 + $0x4f8] sm:$0xff] }
  0xfe   : > { %2186 = vmatpush3.msra.mxu1 %v759_v42  ;;  %2152 = vmatprep.subr.mxu0 %v662_v43  ;;  %v841_v42 = vld [vmem:[#allocation2 + $0xe] sm:$0xff] }
  0xff   : > { %2187 = vmatprep.subr.mxu1 %v758_v44  ;;  %2153 = vmatpush3.msra.mxu0 %v662_v43  ;;  %v1032_v43 = vld [vmem:[#allocation3 + $0x1] sm:$0xff] }
 0x100   : > { %2188 = vmatpush3.msra.mxu1 %v758_v44  ;;  %2154 = vmatprep.subr.mxu0 %v661_v45  ;;  %v1049_v44 = vld [vmem:[#allocation5 + $0x470] sm:$0xff] }
 0x101   : > { %2189 = vmatprep.subr.mxu1 %v757_v46  ;;  %2155 = vmatpush3.msra.mxu0 %v661_v45  ;;  %v1145_v45 = vld [vmem:[#allocation5 + $0x4f0] sm:$0xff] }
 0x102   : > { %2190 = vmatpush3.msra.mxu1 %v757_v46  ;;  %2156 = vmatprep.subr.mxu0 %v660_v47  ;;  %v1128_v46 = vld [vmem:[#allocation3 + $0x2] sm:$0xff] }
 0x103   : > { %2191 = vmatprep.subr.mxu1 %v756_v48  ;;  %2157 = vmatpush3.msra.mxu0 %v660_v47  ;;  %v1048_v47 = vld [vmem:[#allocation5 + $0x468] sm:$0xff] }
 0x104   : > { %2192 = vmatpush3.msra.mxu1 %v756_v48  ;;  %2158 = vmatprep.subr.mxu0 %v659_v49  ;;  %v1144_v48 = vld [vmem:[#allocation5 + $0x4e8] sm:$0xff] }
 0x105   : > { %2193 = vmatprep.subr.mxu1 %v755_v50  ;;  %2159 = vmatpush3.msra.mxu0 %v659_v49  ;;  %v1047_v49 = vld [vmem:[#allocation5 + $0x460] sm:$0xff] }
 0x106   : > { %2194 = vmatpush3.msra.mxu1 %v755_v50  ;;  %2160 = vmatprep.subr.mxu0 %v658_v51  ;;  %v1143_v50 = vld [vmem:[#allocation5 + $0x4e0] sm:$0xff] }
 0x107   : > { %2195 = vmatprep.subr.mxu1 %v754_v52  ;;  %2161 = vmatpush3.msra.mxu0 %v658_v51  ;;  %v1046_v51 = vld [vmem:[#allocation5 + $0x458] sm:$0xff] }
 0x108   : > { %2196 = vmatpush3.msra.mxu1 %v754_v52  ;;  %2162 = vmatprep.subr.mxu0 %v657_v53  ;;  %v1142_v52 = vld [vmem:[#allocation5 + $0x4d8] sm:$0xff] }
 0x109   : > { %2197 = vmatprep.subr.mxu1 %v753_v54  ;;  %2163 = vmatpush3.msra.mxu0 %v657_v53  ;;  %v1045_v53 = vld [vmem:[#allocation5 + $0x450] sm:$0xff] }
 0x10a   : > { %2198 = vmatpush3.msra.mxu1 %v753_v54  ;;  %2164 = vmatprep.subr.mxu0 %v656_v55  ;;  %v1141_v54 = vld [vmem:[#allocation5 + $0x4d0] sm:$0xff] }
 0x10b   : > { %2199 = vmatprep.subr.mxu1 %v752_v56  ;;  %2165 = vmatpush3.msra.mxu0 %v656_v55  ;;  %v1044_v55 = vld [vmem:[#allocation5 + $0x448] sm:$0xff] }
 0x10c   : > { %2200 = vmatpush3.msra.mxu1 %v752_v56  ;;  %2166 = vmatprep.subr.mxu0 %v655_v57  ;;  %v1140_v56 = vld [vmem:[#allocation5 + $0x4c8] sm:$0xff] }
 0x10d   : > { %2201 = vmatprep.subr.mxu1 %v751_v58  ;;  %2167 = vmatpush3.msra.mxu0 %v655_v57  ;;  %v1043_v57 = vld [vmem:[#allocation5 + $0x440] sm:$0xff] }
 0x10e   : > { %2202 = vmatpush3.msra.mxu1 %v751_v58  ;;  %2168 = vmatprep.subr.mxu0 %v654_v59  ;;  %v1139_v58 = vld [vmem:[#allocation5 + $0x4c0] sm:$0xff] }
 0x10f   : > { %2203 = vmatprep.subr.mxu1 %v750_v60  ;;  %2169 = vmatpush3.msra.mxu0 %v654_v59  ;;  %v1042_v59 = vld [vmem:[#allocation5 + $0x438] sm:$0xff] }
 0x110   : > { %2204 = vmatpush3.msra.mxu1 %v750_v60  ;;  %2170 = vmatprep.subr.mxu0 %v653_v61  ;;  %v1138_v60 = vld [vmem:[#allocation5 + $0x4b8] sm:$0xff] }
 0x111   : > { %2205 = vmatprep.subr.mxu1 %v749_v62  ;;  %2171 = vmatpush3.msra.mxu0 %v653_v61  ;;  %v1041_v61 = vld [vmem:[#allocation5 + $0x430] sm:$0xff] }
 0x112   : > { %2206 = vmatpush3.msra.mxu1 %v749_v62  ;;  %2172 = vmatprep.subr.mxu0 %v652_v63  ;;  %v1137_v62 = vld [vmem:[#allocation5 + $0x4b0] sm:$0xff] }
 0x113   : > { %2207 = vmatprep.subr.mxu1 %v748_v0  ;;  %2173 = vmatpush3.msra.mxu0 %v652_v63  ;;  %v1040_v63 = vld [vmem:[#allocation5 + $0x428] sm:$0xff] }
 0x114   : > { %2208 = vmatpush3.msra.mxu1 %v748_v0  ;;  %2174 = vmatprep.subr.mxu0 %v651_v1  ;;  %v1136_v0 = vld [vmem:[#allocation5 + $0x4a8] sm:$0xff] }
 0x115   : > { %2209 = vmatprep.subr.mxu1 %v747_v2  ;;  %2175 = vmatpush3.msra.mxu0 %v651_v1  ;;  %v1039_v1 = vld [vmem:[#allocation5 + $0x420] sm:$0xff] }
 0x116   : > { %2210 = vmatpush3.msra.mxu1 %v747_v2  ;;  %2177 = vmatmul.mubr.f32.vlgmr.msra.gmra.mxu0 %v649_v5  ;;  %v1135_v2 = vld [vmem:[#allocation5 + $0x4a0] sm:$0xff]  ;;  %v1037_v5 = vld [vmem:[#allocation5 + $0x410] sm:$0xff] }
 0x117   : > { %2212 = vmatmul.mubr.f32.vlgmr.msra.gmra.mxu1 %v745_v6  ;;  %2214 = vmatprep.subr.mxu0 %v858_v3  ;;  %v1133_v6 = vld [vmem:[#allocation5 + $0x490] sm:$0xff] }
 0x118   : > { %2249 = vmatprep.subr.mxu1 %v954_v4  ;;  %2215 = vmatpush3.msra.mxu0 %v858_v3  ;;  %v1038_v3 = vld [vmem:[#allocation5 + $0x418] sm:$0xff] }
 0x119   : > { %2246 = vmatprep.mubr.f32.mxu0 %v840_v8  ;;  %2250 = vmatpush3.msra.mxu1 %v954_v4  ;;  %v1134_v4 = vld [vmem:[#allocation5 + $0x498] sm:$0xff]  ;;  %v1132_v8 = vld [vmem:[#allocation5 + $0x488] sm:$0xff] }
 0x11a   : > { %2216 = vmatprep.subr.mxu0 %v857_v7  ;;  %2251 = vmatprep.subr.mxu1 %v953_v9 }
 0x11b   : > { %2217 = vmatpush3.msra.mxu0 %v857_v7  ;;  %2252 = vmatpush3.msra.mxu1 %v953_v9  ;;  %v1036_v7 = vld [vmem:[#allocation5 + $0x408] sm:$0xff]  ;;  %v1035_v9 = vld [vmem:[#allocation5 + $0x400] sm:$0xff] }
 0x11c   : > { %2218 = vmatprep.subr.mxu0 %v856_v10  ;;  %2253 = vmatprep.subr.mxu1 %v952_v11 }
 0x11d   : > { %2219 = vmatpush3.msra.mxu0 %v856_v10  ;;  %2254 = vmatpush3.msra.mxu1 %v952_v11  ;;  %v1131_v10 = vld [vmem:[#allocation5 + $0x480] sm:$0xff]  ;;  %v1242_v11 = vld [vmem:[#allocation5 + $0x578] sm:$0xff] }
 0x11e   : > { %2220 = vmatprep.subr.mxu0 %v855_v12  ;;  %2255 = vmatprep.subr.mxu1 %v951_v13 }
 0x11f   : > { %2221 = vmatpush3.msra.mxu0 %v855_v12  ;;  %2256 = vmatpush3.msra.mxu1 %v951_v13  ;;  %v1338_v12 = vld [vmem:[#allocation5 + $0x5f8] sm:$0xff] }
 0x120   : > { %2222 = vmatprep.subr.mxu0 %v854_v14  ;;  %2257 = vmatprep.subr.mxu1 %v950_v15  ;;  %v1033_v13 = vld [vmem:[#allocation3 + $0x9] sm:$0xff] }
 0x121   : > { %2223 = vmatpush3.msra.mxu0 %v854_v14  ;;  %2258 = vmatpush3.msra.mxu1 %v950_v15  ;;  %v1129_v14 = vld [vmem:[#allocation3 + $0xa] sm:$0xff] }
 0x122   : > { %2224 = vmatprep.subr.mxu0 %v853_v16  ;;  %2259 = vmatprep.subr.mxu1 %v949_v17  ;;  %v1224_v15 = vld [vmem:[#allocation3 + $0x3] sm:$0xff] }
 0x123   : > { %2225 = vmatpush3.msra.mxu0 %v853_v16  ;;  %2260 = vmatpush3.msra.mxu1 %v949_v17  ;;  %v1241_v16 = vld [vmem:[#allocation5 + $0x570] sm:$0xff] }
 0x124   : > { %2226 = vmatprep.subr.mxu0 %v852_v18  ;;  %2261 = vmatprep.subr.mxu1 %v948_v19  ;;  %v1337_v17 = vld [vmem:[#allocation5 + $0x5f0] sm:$0xff] }
 0x125   : > { %2227 = vmatpush3.msra.mxu0 %v852_v18  ;;  %2262 = vmatpush3.msra.mxu1 %v948_v19  ;;  %v1320_v18 = vld [vmem:[#allocation3 + $0x4] sm:$0xff] }
 0x126   : > { %2228 = vmatprep.subr.mxu0 %v851_v20  ;;  %2263 = vmatprep.subr.mxu1 %v947_v21  ;;  %v1240_v19 = vld [vmem:[#allocation5 + $0x568] sm:$0xff] }
 0x127   : > { %2229 = vmatpush3.msra.mxu0 %v851_v20  ;;  %2264 = vmatpush3.msra.mxu1 %v947_v21  ;;  %v1336_v20 = vld [vmem:[#allocation5 + $0x5e8] sm:$0xff]  ;;  %v1239_v21 = vld [vmem:[#allocation5 + $0x560] sm:$0xff] }
 0x128   : > { %2230 = vmatprep.subr.mxu0 %v850_v22  ;;  %2265 = vmatprep.subr.mxu1 %v946_v23 }
 0x129   : > { %2231 = vmatpush3.msra.mxu0 %v850_v22  ;;  %2266 = vmatpush3.msra.mxu1 %v946_v23  ;;  %v1335_v22 = vld [vmem:[#allocation5 + $0x5e0] sm:$0xff]  ;;  %v1238_v23 = vld [vmem:[#allocation5 + $0x558] sm:$0xff] }
 0x12a   : > { %2232 = vmatprep.subr.mxu0 %v849_v24  ;;  %2267 = vmatprep.subr.mxu1 %v945_v25 }
 0x12b   : > { %2233 = vmatpush3.msra.mxu0 %v849_v24  ;;  %2268 = vmatpush3.msra.mxu1 %v945_v25  ;;  %v1334_v24 = vld [vmem:[#allocation5 + $0x5d8] sm:$0xff]  ;;  %v1237_v25 = vld [vmem:[#allocation5 + $0x550] sm:$0xff] }
 0x12c   : > { %2234 = vmatprep.subr.mxu0 %v848_v26  ;;  %2269 = vmatprep.subr.mxu1 %v944_v27 }
 0x12d   : > { %2235 = vmatpush3.msra.mxu0 %v848_v26  ;;  %2270 = vmatpush3.msra.mxu1 %v944_v27  ;;  %v1333_v26 = vld [vmem:[#allocation5 + $0x5d0] sm:$0xff]  ;;  %v1236_v27 = vld [vmem:[#allocation5 + $0x548] sm:$0xff] }
 0x12e   : > { %2236 = vmatprep.subr.mxu0 %v847_v28  ;;  %2271 = vmatprep.subr.mxu1 %v943_v29 }
 0x12f   : > { %2237 = vmatpush3.msra.mxu0 %v847_v28  ;;  %2272 = vmatpush3.msra.mxu1 %v943_v29  ;;  %v1332_v28 = vld [vmem:[#allocation5 + $0x5c8] sm:$0xff]  ;;  %v1235_v29 = vld [vmem:[#allocation5 + $0x540] sm:$0xff] }
 0x130   : > { %2238 = vmatprep.subr.mxu0 %v846_v30  ;;  %2273 = vmatprep.subr.mxu1 %v942_v31 }
 0x131   : > { %2239 = vmatpush3.msra.mxu0 %v846_v30  ;;  %2274 = vmatpush3.msra.mxu1 %v942_v31  ;;  %v1331_v30 = vld [vmem:[#allocation5 + $0x5c0] sm:$0xff]  ;;  %v1234_v31 = vld [vmem:[#allocation5 + $0x538] sm:$0xff] }
 0x132   : > { %2240 = vmatprep.subr.mxu0 %v845_v32  ;;  %2275 = vmatprep.subr.mxu1 %v941_v33 }
 0x133   : > { %2241 = vmatpush3.msra.mxu0 %v845_v32  ;;  %2276 = vmatpush3.msra.mxu1 %v941_v33  ;;  %v1330_v32 = vld [vmem:[#allocation5 + $0x5b8] sm:$0xff]  ;;  %v1233_v33 = vld [vmem:[#allocation5 + $0x530] sm:$0xff] }
 0x134   : > { %2242 = vmatprep.subr.mxu0 %v844_v34  ;;  %2277 = vmatprep.subr.mxu1 %v940_v35 }
 0x135   : > { %2243 = vmatpush3.msra.mxu0 %v844_v34  ;;  %2278 = vmatpush3.msra.mxu1 %v940_v35  ;;  %v1329_v34 = vld [vmem:[#allocation5 + $0x5b0] sm:$0xff]  ;;  %v1232_v35 = vld [vmem:[#allocation5 + $0x528] sm:$0xff] }
 0x136   : > { %2244 = vmatprep.subr.mxu0 %v843_v36  ;;  %2279 = vmatprep.subr.mxu1 %v939_v37 }
 0x137   : > { %2245 = vmatpush3.msra.mxu0 %v843_v36  ;;  %2280 = vmatpush3.msra.mxu1 %v939_v37  ;;  %v1328_v36 = vld [vmem:[#allocation5 + $0x5a8] sm:$0xff]  ;;  %v1231_v37 = vld [vmem:[#allocation5 + $0x520] sm:$0xff] }
 0x138   : > { %2281 = vmatprep.mubr.f32.mxu1 %v936_v38  ;;  %2247 = vmatmul.mubr.f32.vlgmr.msra.gmra.mxu0 %v841_v42  ;;  %v1327_v38 = vld [vmem:[#allocation5 + $0x5a0] sm:$0xff]  ;;  %v1325_v42 = vld [vmem:[#allocation5 + $0x590] sm:$0xff] }
 0x139   : > { %2282 = vmatmul.mubr.f32.vlgmr.msra.gmra.mxu1 %v937_v39  ;;  %2284 = vmatprep.subr.mxu0 %v1050_v40  ;;  %v1230_v39 = vld [vmem:[#allocation5 + $0x518] sm:$0xff] }
 0x13a   : > { %2319 = vmatprep.subr.mxu1 %v1146_v41  ;;  %2285 = vmatpush3.msra.mxu0 %v1050_v40  ;;  %v1326_v40 = vld [vmem:[#allocation5 + $0x598] sm:$0xff] }
 0x13b   : > { %2316 = vmatprep.mubr.f32.mxu0 %v1032_v43  ;;  %2320 = vmatpush3.msra.mxu1 %v1146_v41  ;;  %v1229_v41 = vld [vmem:[#allocation5 + $0x510] sm:$0xff]  ;;  %v1228_v43 = vld [vmem:[#allocation5 + $0x508] sm:$0xff] }
 0x13c   : > { %2351 = vmatprep.mubr.f32.mxu1 %v1128_v46  ;;  %2286 = vmatprep.subr.mxu0 %v1049_v44  ;;  %v1323_v46 = vld [vmem:[#allocation5 + $0x580] sm:$0xff] }
 0x13d   : > { %2321 = vmatprep.subr.mxu1 %v1145_v45  ;;  %2287 = vmatpush3.msra.mxu0 %v1049_v44  ;;  %v1324_v44 = vld [vmem:[#allocation5 + $0x588] sm:$0xff] }
 0x13e   : > { %2322 = vmatpush3.msra.mxu1 %v1145_v45  ;;  %2288 = vmatprep.subr.mxu0 %v1048_v47  ;;  %v1227_v45 = vld [vmem:[#allocation5 + $0x500] sm:$0xff] }
 0x13f   : > { %2323 = vmatprep.subr.mxu1 %v1144_v48  ;;  %2289 = vmatpush3.msra.mxu0 %v1048_v47  ;;  %v1434_v47 = vld [vmem:[#allocation5 + $0x678] sm:$0xff] }
 0x140   : > { %2324 = vmatpush3.msra.mxu1 %v1144_v48  ;;  %2290 = vmatprep.subr.mxu0 %v1047_v49  ;;  %v1530_v48 = vld [vmem:[#allocation5 + $0x6f8] sm:$0xff] }
 0x141   : > { %2325 = vmatprep.subr.mxu1 %v1143_v50  ;;  %2291 = vmatpush3.msra.mxu0 %v1047_v49  ;;  %v1225_v49 = vld [vmem:[#allocation3 + $0xb] sm:$0xff] }
 0x142   : > { %2326 = vmatpush3.msra.mxu1 %v1143_v50  ;;  %2292 = vmatprep.subr.mxu0 %v1046_v51  ;;  %v1321_v50 = vld [vmem:[#allocation3 + $0xc] sm:$0xff] }
 0x143   : > { %2327 = vmatprep.subr.mxu1 %v1142_v52  ;;  %2293 = vmatpush3.msra.mxu0 %v1046_v51  ;;  %v1416_v51 = vld [vmem:[#allocation3 + $0x5] sm:$0xff] }
 0x144   : > { %2328 = vmatpush3.msra.mxu1 %v1142_v52  ;;  %2294 = vmatprep.subr.mxu0 %v1045_v53  ;;  %v1433_v52 = vld [vmem:[#allocation5 + $0x670] sm:$0xff] }
 0x145   : > { %2329 = vmatprep.subr.mxu1 %v1141_v54  ;;  %2295 = vmatpush3.msra.mxu0 %v1045_v53  ;;  %v1529_v53 = vld [vmem:[#allocation5 + $0x6f0] sm:$0xff] }
 0x146   : > { %2330 = vmatpush3.msra.mxu1 %v1141_v54  ;;  %2296 = vmatprep.subr.mxu0 %v1044_v55  ;;  %v1512_v54 = vld [vmem:[#allocation3 + $0x6] sm:$0xff] }
 0x147   : > { %2331 = vmatprep.subr.mxu1 %v1140_v56  ;;  %2297 = vmatpush3.msra.mxu0 %v1044_v55  ;;  %v1432_v55 = vld [vmem:[#allocation5 + $0x668] sm:$0xff] }
 0x148   : > { %2332 = vmatpush3.msra.mxu1 %v1140_v56  ;;  %2298 = vmatprep.subr.mxu0 %v1043_v57  ;;  %v1528_v56 = vld [vmem:[#allocation5 + $0x6e8] sm:$0xff] }
 0x149   : > { %2333 = vmatprep.subr.mxu1 %v1139_v58  ;;  %2299 = vmatpush3.msra.mxu0 %v1043_v57  ;;  %v1431_v57 = vld [vmem:[#allocation5 + $0x660] sm:$0xff] }
 0x14a   : > { %2334 = vmatpush3.msra.mxu1 %v1139_v58  ;;  %2300 = vmatprep.subr.mxu0 %v1042_v59  ;;  %v1527_v58 = vld [vmem:[#allocation5 + $0x6e0] sm:$0xff] }
 0x14b   : > { %2335 = vmatprep.subr.mxu1 %v1138_v60  ;;  %2301 = vmatpush3.msra.mxu0 %v1042_v59  ;;  %v1430_v59 = vld [vmem:[#allocation5 + $0x658] sm:$0xff] }
 0x14c   : > { %2336 = vmatpush3.msra.mxu1 %v1138_v60  ;;  %2302 = vmatprep.subr.mxu0 %v1041_v61  ;;  %v1526_v60 = vld [vmem:[#allocation5 + $0x6d8] sm:$0xff] }
 0x14d   : > { %2337 = vmatprep.subr.mxu1 %v1137_v62  ;;  %2303 = vmatpush3.msra.mxu0 %v1041_v61  ;;  %v1429_v61 = vld [vmem:[#allocation5 + $0x650] sm:$0xff] }
 0x14e   : > { %2338 = vmatpush3.msra.mxu1 %v1137_v62  ;;  %2304 = vmatprep.subr.mxu0 %v1040_v63  ;;  %v1525_v62 = vld [vmem:[#allocation5 + $0x6d0] sm:$0xff] }
 0x14f   : > { %2339 = vmatprep.subr.mxu1 %v1136_v0  ;;  %2305 = vmatpush3.msra.mxu0 %v1040_v63  ;;  %v1428_v63 = vld [vmem:[#allocation5 + $0x648] sm:$0xff] }
 0x150   : > { %2340 = vmatpush3.msra.mxu1 %v1136_v0  ;;  %2306 = vmatprep.subr.mxu0 %v1039_v1  ;;  %v1524_v0 = vld [vmem:[#allocation5 + $0x6c8] sm:$0xff] }
 0x151   : > { %2341 = vmatprep.subr.mxu1 %v1135_v2  ;;  %2307 = vmatpush3.msra.mxu0 %v1039_v1  ;;  %v1427_v1 = vld [vmem:[#allocation5 + $0x640] sm:$0xff] }
 0x152   : > { %2342 = vmatpush3.msra.mxu1 %v1135_v2  ;;  %2308 = vmatprep.subr.mxu0 %v1038_v3  ;;  %v1523_v2 = vld [vmem:[#allocation5 + $0x6c0] sm:$0xff] }
 0x153   : > { %2343 = vmatprep.subr.mxu1 %v1134_v4  ;;  %2309 = vmatpush3.msra.mxu0 %v1038_v3  ;;  %v1426_v3 = vld [vmem:[#allocation5 + $0x638] sm:$0xff] }
 0x154   : > { %2344 = vmatpush3.msra.mxu1 %v1134_v4  ;;  %2310 = vmatprep.subr.mxu0 %v1037_v5  ;;  %v1522_v4 = vld [vmem:[#allocation5 + $0x6b8] sm:$0xff] }
 0x155   : > { %2345 = vmatprep.subr.mxu1 %v1133_v6  ;;  %2311 = vmatpush3.msra.mxu0 %v1037_v5  ;;  %v1425_v5 = vld [vmem:[#allocation5 + $0x630] sm:$0xff] }
 0x156   : > { %2346 = vmatpush3.msra.mxu1 %v1133_v6  ;;  %2312 = vmatprep.subr.mxu0 %v1036_v7  ;;  %v1521_v6 = vld [vmem:[#allocation5 + $0x6b0] sm:$0xff] }
 0x157   : > { %2347 = vmatprep.subr.mxu1 %v1132_v8  ;;  %2313 = vmatpush3.msra.mxu0 %v1036_v7  ;;  %v1424_v7 = vld [vmem:[#allocation5 + $0x628] sm:$0xff] }
 0x158   : > { %2348 = vmatpush3.msra.mxu1 %v1132_v8  ;;  %2314 = vmatprep.subr.mxu0 %v1035_v9  ;;  %v1520_v8 = vld [vmem:[#allocation5 + $0x6a8] sm:$0xff] }
 0x159   : > { %2349 = vmatprep.subr.mxu1 %v1131_v10  ;;  %2315 = vmatpush3.msra.mxu0 %v1035_v9  ;;  %v1423_v9 = vld [vmem:[#allocation5 + $0x620] sm:$0xff] }
 0x15a   : > { %2350 = vmatpush3.msra.mxu1 %v1131_v10  ;;  %2317 = vmatmul.mubr.f32.vlgmr.msra.gmra.mxu0 %v1033_v13  ;;  %v1519_v10 = vld [vmem:[#allocation5 + $0x6a0] sm:$0xff]  ;;  %v1421_v13 = vld [vmem:[#allocation5 + $0x610] sm:$0xff] }
 0x15b   : > { %2352 = vmatmul.mubr.f32.vlgmr.msra.gmra.mxu1 %v1129_v14  ;;  %2354 = vmatprep.subr.mxu0 %v1242_v11  ;;  %v1517_v14 = vld [vmem:[#allocation5 + $0x690] sm:$0xff] }
 0x15c   : > { %2389 = vmatprep.subr.mxu1 %v1338_v12  ;;  %2355 = vmatpush3.msra.mxu0 %v1242_v11  ;;  %v1422_v11 = vld [vmem:[#allocation5 + $0x618] sm:$0xff] }
 0x15d   : > { %2386 = vmatprep.mubr.f32.mxu0 %v1224_v15  ;;  %2390 = vmatpush3.msra.mxu1 %v1338_v12  ;;  %v1518_v12 = vld [vmem:[#allocation5 + $0x698] sm:$0xff]  ;;  %v1420_v15 = vld [vmem:[#allocation5 + $0x608] sm:$0xff] }
 0x15e   : > { %2421 = vmatprep.mubr.f32.mxu1 %v1320_v18  ;;  %2356 = vmatprep.subr.mxu0 %v1241_v16  ;;  %v1515_v18 = vld [vmem:[#allocation5 + $0x680] sm:$0xff] }
 0x15f   : > { %2391 = vmatprep.subr.mxu1 %v1337_v17  ;;  %2357 = vmatpush3.msra.mxu0 %v1241_v16  ;;  %v1516_v16 = vld [vmem:[#allocation5 + $0x688] sm:$0xff] }
 0x160   : > { %2392 = vmatpush3.msra.mxu1 %v1337_v17  ;;  %2358 = vmatprep.subr.mxu0 %v1240_v19  ;;  %v1419_v17 = vld [vmem:[#allocation5 + $0x600] sm:$0xff] }
 0x161   : > { %2393 = vmatprep.subr.mxu1 %v1336_v20  ;;  %2359 = vmatpush3.msra.mxu0 %v1240_v19  ;;  %v1417_v19 = vld [vmem:[#allocation3 + $0xd] sm:$0xff] }
 0x162   : > { %2394 = vmatpush3.msra.mxu1 %v1336_v20  ;;  %2360 = vmatprep.subr.mxu0 %v1239_v21  ;;  %v1513_v20 = vld [vmem:[#allocation3 + $0xe] sm:$0xff] }
 0x163   : > { %2395 = vmatprep.subr.mxu1 %v1335_v22  ;;  %2361 = vmatpush3.msra.mxu0 %v1239_v21 }
 0x164   : > { %2396 = vmatpush3.msra.mxu1 %v1335_v22  ;;  %2362 = vmatprep.subr.mxu0 %v1238_v23 }
 0x165   : > { %2397 = vmatprep.subr.mxu1 %v1334_v24  ;;  %2363 = vmatpush3.msra.mxu0 %v1238_v23 }
 0x166   : > { %2398 = vmatpush3.msra.mxu1 %v1334_v24  ;;  %2364 = vmatprep.subr.mxu0 %v1237_v25 }
 0x167   : > { %2399 = vmatprep.subr.mxu1 %v1333_v26  ;;  %2365 = vmatpush3.msra.mxu0 %v1237_v25 }
 0x168   : > { %2400 = vmatpush3.msra.mxu1 %v1333_v26  ;;  %2366 = vmatprep.subr.mxu0 %v1236_v27 }
 0x169   : > { %2401 = vmatprep.subr.mxu1 %v1332_v28  ;;  %2367 = vmatpush3.msra.mxu0 %v1236_v27 }
 0x16a   : > { %2402 = vmatpush3.msra.mxu1 %v1332_v28  ;;  %2368 = vmatprep.subr.mxu0 %v1235_v29 }
 0x16b   : > { %2403 = vmatprep.subr.mxu1 %v1331_v30  ;;  %2369 = vmatpush3.msra.mxu0 %v1235_v29 }
 0x16c   : > { %2404 = vmatpush3.msra.mxu1 %v1331_v30  ;;  %2370 = vmatprep.subr.mxu0 %v1234_v31 }
 0x16d   : > { %2405 = vmatprep.subr.mxu1 %v1330_v32  ;;  %2371 = vmatpush3.msra.mxu0 %v1234_v31 }
 0x16e   : > { %2406 = vmatpush3.msra.mxu1 %v1330_v32  ;;  %2372 = vmatprep.subr.mxu0 %v1233_v33 }
 0x16f   : > { %2407 = vmatprep.subr.mxu1 %v1329_v34  ;;  %2373 = vmatpush3.msra.mxu0 %v1233_v33 }
 0x170   : > { %2408 = vmatpush3.msra.mxu1 %v1329_v34  ;;  %2374 = vmatprep.subr.mxu0 %v1232_v35 }
 0x171   : > { %2409 = vmatprep.subr.mxu1 %v1328_v36  ;;  %2375 = vmatpush3.msra.mxu0 %v1232_v35 }
 0x172   : > { %2410 = vmatpush3.msra.mxu1 %v1328_v36  ;;  %2376 = vmatprep.subr.mxu0 %v1231_v37 }
 0x173   : > { %2411 = vmatprep.subr.mxu1 %v1327_v38  ;;  %2377 = vmatpush3.msra.mxu0 %v1231_v37 }
 0x174   : > { %2412 = vmatpush3.msra.mxu1 %v1327_v38  ;;  %2378 = vmatprep.subr.mxu0 %v1230_v39 }
 0x175   : > { %2413 = vmatprep.subr.mxu1 %v1326_v40  ;;  %2379 = vmatpush3.msra.mxu0 %v1230_v39 }
 0x176   : > { %2414 = vmatpush3.msra.mxu1 %v1326_v40  ;;  %2380 = vmatprep.subr.mxu0 %v1229_v41 }
 0x177   : > { %2415 = vmatprep.subr.mxu1 %v1325_v42  ;;  %2381 = vmatpush3.msra.mxu0 %v1229_v41 }
 0x178   : > { %2416 = vmatpush3.msra.mxu1 %v1325_v42  ;;  %2382 = vmatprep.subr.mxu0 %v1228_v43 }
 0x179   : > { %2417 = vmatprep.subr.mxu1 %v1324_v44  ;;  %2383 = vmatpush3.msra.mxu0 %v1228_v43 }
 0x17a   : > { %2418 = vmatpush3.msra.mxu1 %v1324_v44  ;;  %2384 = vmatprep.subr.mxu0 %v1227_v45 }
 0x17b   : > { %2419 = vmatprep.subr.mxu1 %v1323_v46  ;;  %2385 = vmatpush3.msra.mxu0 %v1227_v45 }
 0x17c   : > { %2420 = vmatpush3.msra.mxu1 %v1323_v46  ;;  %2387 = vmatmul.mubr.f32.vlgmr.msra.gmra.mxu0 %v1225_v49 }
 0x17d   : > { %2422 = vmatmul.mubr.f32.vlgmr.msra.gmra.mxu1 %v1321_v50  ;;  %2424 = vmatprep.subr.mxu0 %v1434_v47 }
 0x17e   : > { %2459 = vmatprep.subr.mxu1 %v1530_v48  ;;  %2425 = vmatpush3.msra.mxu0 %v1434_v47 }
 0x17f   : > { %2456 = vmatprep.mubr.f32.mxu0 %v1416_v51  ;;  %2460 = vmatpush3.msra.mxu1 %v1530_v48 }
 0x180   : > { %2491 = vmatprep.mubr.f32.mxu1 %v1512_v54  ;;  %2426 = vmatprep.subr.mxu0 %v1433_v52 }
 0x181   : > { %2461 = vmatprep.subr.mxu1 %v1529_v53  ;;  %2427 = vmatpush3.msra.mxu0 %v1433_v52 }
 0x182   : > { %2462 = vmatpush3.msra.mxu1 %v1529_v53  ;;  %2428 = vmatprep.subr.mxu0 %v1432_v55 }
 0x183   : > { %2463 = vmatprep.subr.mxu1 %v1528_v56  ;;  %2429 = vmatpush3.msra.mxu0 %v1432_v55 }
 0x184   : > { %2464 = vmatpush3.msra.mxu1 %v1528_v56  ;;  %2430 = vmatprep.subr.mxu0 %v1431_v57 }
 0x185   : > { %2465 = vmatprep.subr.mxu1 %v1527_v58  ;;  %2431 = vmatpush3.msra.mxu0 %v1431_v57 }
 0x186   : > { %2466 = vmatpush3.msra.mxu1 %v1527_v58  ;;  %2432 = vmatprep.subr.mxu0 %v1430_v59 }
 0x187   : > { %2467 = vmatprep.subr.mxu1 %v1526_v60  ;;  %2433 = vmatpush3.msra.mxu0 %v1430_v59 }
 0x188   : > { %2468 = vmatpush3.msra.mxu1 %v1526_v60  ;;  %2434 = vmatprep.subr.mxu0 %v1429_v61 }
 0x189   : > { %2469 = vmatprep.subr.mxu1 %v1525_v62  ;;  %2435 = vmatpush3.msra.mxu0 %v1429_v61 }
 0x18a   : > { %2470 = vmatpush3.msra.mxu1 %v1525_v62  ;;  %2436 = vmatprep.subr.mxu0 %v1428_v63 }
 0x18b   : > { %2471 = vmatprep.subr.mxu1 %v1524_v0  ;;  %2437 = vmatpush3.msra.mxu0 %v1428_v63 }
 0x18c   : > { %2472 = vmatpush3.msra.mxu1 %v1524_v0  ;;  %2438 = vmatprep.subr.mxu0 %v1427_v1 }
 0x18d   : > { %2473 = vmatprep.subr.mxu1 %v1523_v2  ;;  %2439 = vmatpush3.msra.mxu0 %v1427_v1 }
 0x18e   : > { %2474 = vmatpush3.msra.mxu1 %v1523_v2  ;;  %2440 = vmatprep.subr.mxu0 %v1426_v3 }
 0x18f   : > { %2475 = vmatprep.subr.mxu1 %v1522_v4  ;;  %2441 = vmatpush3.msra.mxu0 %v1426_v3 }
 0x190   : > { %2476 = vmatpush3.msra.mxu1 %v1522_v4  ;;  %2442 = vmatprep.subr.mxu0 %v1425_v5 }
 0x191   : > { %2477 = vmatprep.subr.mxu1 %v1521_v6  ;;  %2443 = vmatpush3.msra.mxu0 %v1425_v5 }
 0x192   : > { %2478 = vmatpush3.msra.mxu1 %v1521_v6  ;;  %2444 = vmatprep.subr.mxu0 %v1424_v7  ;;  %v1609_v6 = vstv %s1608_s21 }
 0x193   : > { %2479 = vmatprep.subr.mxu1 %v1520_v8  ;;  %2445 = vmatpush3.msra.mxu0 %v1424_v7  ;;  %v2038_v21 = vpop.f32.mrf.mxu0 }
 0x194   : > { %2480 = vmatpush3.msra.mxu1 %v1520_v8  ;;  %2446 = vmatprep.subr.mxu0 %v1423_v9  ;;  %v2073_v22 = vpop.f32.mrf.mxu1 }
 0x195   : > { %2481 = vmatprep.subr.mxu1 %v1519_v10  ;;  %2447 = vmatpush3.msra.mxu0 %v1423_v9  ;;  %v372_v23 = vpop.f32.mrf.mxu0  ;;  %v453_v26 = vadd.f32 %v2073_v22, %v2038_v21 }
 0x196   : > { %2482 = vmatpush3.msra.mxu1 %v1519_v10  ;;  %2448 = vmatprep.subr.mxu0 %v1422_v11  ;;  %v447_v25 = vpop.f32.mrf.mxu1 }
 0x197   : > { %2483 = vmatprep.subr.mxu1 %v1518_v12  ;;  %2449 = vmatpush3.msra.mxu0 %v1422_v11  ;;  %v448_v29 = vadd.f32 %v447_v25, %v372_v23 }
 0x198   : > { %2484 = vmatpush3.msra.mxu1 %v1518_v12  ;;  %2450 = vmatprep.subr.mxu0 %v1421_v13 }
 0x199   : > { %2485 = vmatprep.subr.mxu1 %v1517_v14  ;;  %2451 = vmatpush3.msra.mxu0 %v1421_v13 }
 0x19a   : > { %2486 = vmatpush3.msra.mxu1 %v1517_v14  ;;  %2452 = vmatprep.subr.mxu0 %v1420_v15 }
 0x19b   : > { %2487 = vmatprep.subr.mxu1 %v1516_v16  ;;  %2453 = vmatpush3.msra.mxu0 %v1420_v15 }
 0x19c   : > { %2488 = vmatpush3.msra.mxu1 %v1516_v16  ;;  %2454 = vmatprep.subr.mxu0 %v1419_v17 }
 0x19d   : > { %2489 = vmatprep.subr.mxu1 %v1515_v18  ;;  %2455 = vmatpush3.msra.mxu0 %v1419_v17 }
 0x19e   : > { %2490 = vmatpush3.msra.mxu1 %v1515_v18  ;;  %2457 = vmatmul.mubr.f32.vlgmr.msra.gmra.mxu0 %v1417_v19 }
 0x19f   : > { %2492 = vmatmul.mubr.f32.vlgmr.msra.gmra.mxu1 %v1513_v20 }
 0x1b4   : > { %v2108_v24 = vpop.f32.mrf.mxu0 }
 0x1b5   : > { %v2143_v27 = vpop.f32.mrf.mxu1  ;;  %v551_v30 = vadd.f32 %v2108_v24, %v453_v26 }
 0x1b6   : > { %v541_v28 = vpop.f32.mrf.mxu0 }
 0x1b7   : > { %v550_v32 = vadd.f32 %v541_v28, %v448_v29  ;;  %v637_v33 = vpop.f32.mrf.mxu1  ;;  %v647_v34 = vadd.f32 %v2143_v27, %v551_v30 }
 0x1b9   : > { %v646_v37 = vadd.f32 %v637_v33, %v550_v32 }
 0x1d6   : > { %v2178_v31 = vpop.f32.mrf.mxu0 }
 0x1d7   : > { %v2213_v35 = vpop.f32.mrf.mxu1  ;;  %v743_v38 = vadd.f32 %v2178_v31, %v647_v34 }
 0x1d8   : > { %v733_v36 = vpop.f32.mrf.mxu0 }
 0x1d9   : > { %v742_v40 = vadd.f32 %v733_v36, %v646_v37  ;;  %v829_v41 = vpop.f32.mrf.mxu1  ;;  %v839_v42 = vadd.f32 %v2213_v35, %v743_v38 }
 0x1db   : > { %v838_v45 = vadd.f32 %v829_v41, %v742_v40 }
 0x1f8   : > { %v2248_v39 = vpop.f32.mrf.mxu0 }
 0x1f9   : > { %v2283_v43 = vpop.f32.mrf.mxu1  ;;  %v935_v46 = vadd.f32 %v2248_v39, %v839_v42 }
 0x1fa   : > { %v925_v44 = vpop.f32.mrf.mxu0 }
 0x1fb   : > { %v934_v48 = vadd.f32 %v925_v44, %v838_v45  ;;  %v1021_v49 = vpop.f32.mrf.mxu1  ;;  %v1031_v50 = vadd.f32 %v2283_v43, %v935_v46 }
 0x1fd   : > { %v1030_v53 = vadd.f32 %v1021_v49, %v934_v48 }
 0x21a   : > { %v2318_v47 = vpop.f32.mrf.mxu0 }
 0x21b   : > { %v2353_v51 = vpop.f32.mrf.mxu1  ;;  %v1127_v54 = vadd.f32 %v2318_v47, %v1031_v50 }
 0x21c   : > { %v1117_v52 = vpop.f32.mrf.mxu0 }
 0x21d   : > { %v1126_v56 = vadd.f32 %v1117_v52, %v1030_v53  ;;  %v1213_v57 = vpop.f32.mrf.mxu1  ;;  %v1223_v58 = vadd.f32 %v2353_v51, %v1127_v54 }
 0x21f   : > { %v1222_v61 = vadd.f32 %v1213_v57, %v1126_v56 }
 0x23c   : > { %v2388_v55 = vpop.f32.mrf.mxu0 }
 0x23d   : > { %v2423_v59 = vpop.f32.mrf.mxu1  ;;  %v1319_v62 = vadd.f32 %v2388_v55, %v1223_v58 }
 0x23e   : > { %v1309_v60 = vpop.f32.mrf.mxu0 }
 0x23f   : > { %v1318_v63 = vadd.f32 %v1309_v60, %v1222_v61  ;;  %v1405_v0 = vpop.f32.mrf.mxu1  ;;  %v1415_v1 = vadd.f32 %v2423_v59, %v1319_v62 }
 0x241   : > { %v1414_v4 = vadd.f32 %v1405_v0, %v1318_v63 }
 0x25e   : > { %v2458_v2 = vpop.f32.mrf.mxu0 }
 0x25f   : > { %v2493_v3 = vpop.f32.mrf.mxu1  ;;  %v1511_v5 = vadd.f32 %v2458_v2, %v1415_v1 }
 0x260   : > { %v1501_v7 = vpop.f32.mrf.mxu0 }
 0x261   : > { %v1607_v8 = vadd.f32 %v2493_v3, %v1511_v5  ;;  %v1510_v9 = vadd.f32 %v1501_v7, %v1414_v4  ;;  %v1597_v10 = vpop.f32.mrf.mxu1 }
 0x263   : > { %v1611_v11 = vadd.f32 %v1609_v6, %v1607_v8  ;;  %v1606_v12 = vadd.f32 %v1597_v10, %v1510_v9 }
 0x265   : > { %v1744_v13 = vmul.f32 -1.442695, %v1611_v11  ;;  %v1610_v14 = vadd.f32 %v1609_v6, %v1606_v12 }
 0x267   : > { %2557 = vpow2.f32 %v1744_v13  ;;  %v1743_v15 = vmul.f32 -1.442695, %v1610_v14 }
 0x269   : > { %2559 = vpow2.f32 %v1743_v15 }
 0x274   : > { %v2558_v16 = vpop.eup %2557 }
 0x275   : > { %v1619_v17 = vadd.f32 1.0, %v2558_v16 }
 0x276   : > { %v2560_v18 = vpop.eup %2559 }
 0x277   : > { %2561 = vrcp.f32 %v1619_v17  ;;  %v1618_v19 = vadd.f32 1.0, %v2560_v18 }
 0x279   : > { %2563 = vrcp.f32 %v1618_v19 }
 0x284   : > { %v2562_v20 = vpop.eup %2561 }
 0x285   : > { %1626 = vst.msk [vmem:[%s204_s13 + $0x8] sm:$0xff] %vm1624_vm5, %v2562_v20 }
 0x286   : > { %v2564_v21 = vpop.eup %2563 }
 0x287   : > { %1625 = vst.msk [vmem:[%s204_s13] sm:$0xff] %vm1624_vm5, %v2564_v21 }
 0x288   : > { %2632 = shalt.err (!%p2629_p0)
}
 0x289   : > { %s2633_s11 = scalar_lea.hbm %s2874_s4, 256  ;;  %s2637_s26 = scalar_lea.hbm %s2922_s3, 512 }
 0x28a   : > { %p2634_p5 = scmp.ne.s32.totalorder %s2874_s4, %s2633_s11  ;;  %p2638_p6 = scmp.lt.s32.totalorder %s2874_s4, %s2922_s3 }
 0x28b   : > { %p2639_p7 = scmp.lt.s32.totalorder %s2637_s26, %s2633_s11 }
 0x28c   : > { %p2635_p2 = pnand %p2634_p5, %p2938_p3 }
 0x28d   : > { %p2640_p4 = por %p2639_p7, %p2638_p6 }
 0x28e   : > { %p2636_p1 = pneg %p2635_p2 }
 0x290   : > { %p2641_p8 = pnand %p2640_p4, %p2636_p1 }
 0x292   : > { %2644 = shalt.err (!%p2641_p8)
}
 0x293   : > { %s2696_s21 = smov 128   ;;  %s2697_s29 = smov 8  }
 0x294   : > { %2500 = dma.vmem_to_hbm [thread:$0]  (%p2938_p3), %s2876_s22, 256, %s2874_s4, %s1628_s5, %s2696_s21, %s2696_s21, %s2697_s29  }
 0x295 PF: > { %s1656_s30 = sand.u32 1, %s2675_s14   ;;  %p2939_p11 = scmp.ne.s32.totalorder %s2928_s20, 0 }
 0x296   : > { %p2940_p9 = scmp.ge.s32.totalorder %s2687_s17, 2  ;;  %s1657_s13 = scalar_lea.sflag [#allocation7], %s1656_s30 }
 0x298   : > { %p2511_p10 = pnand %p2940_p9, %p2939_p11 }
 0x29a   : > { %p2512_p12 = pneg %p2511_p10 }
 0x29c   : > { %2670 = dma.done.wait (%p2512_p12), %s1657_s13, 256  }
 0x29d   : > { %2672 = vsyncadd (%p2512_p12), %s1657_s13, 4294967040  ;;  %p18_p13 = scmp.ge.s32.totalorder %s2775_s25, 4   ;;  %s2941_s14 = smov %s2679_s15 }
 0x29e   : > { %s2942_s15 = smov %s2683_s16  ;;  %s2943_s16 = smov %s2795_s6 }
 0x29f   : > { %s2944_s17 = smov %s2775_s25  ;;  %20 = sbr.rel (!%p18_p13) target bundleno = 8 (0x8), region = 98 }
 0x2a4   :  { %1662 = vsyncpa [#allocation6], 1 }
 0x2a5   :  { %1664 = vsyncpa [#allocation6 + $0x1], 1 }
 0x2a6   :  { %1665 = vsyncpa [#allocation9], 1 }
 0x2a7   :  { %1667 = vsyncpa [#allocation9 + $0x1], 1 }
 0x2a8   :  { %1668 = vsyncpa [#allocation7], 1 }
 0x2a9   :  { %1670 = vsyncpa [#allocation7 + $0x1], 1 }

</bundles_post_ra>
